<compile_context>
chip_gen: v5e
topology: v5e:2x2
jax: 0.10.0
libtpu: 0.0.40
codegen_flags: <defaults>
</compile_context>

<pallas_src>
import numpy as np

import jax
import jax.numpy as jnp
from jax.experimental import pallas as pl
from jax.experimental.pallas import tpu as pltpu


# ----------------------------------------------------------------------------
# Host-side slab packing
# ----------------------------------------------------------------------------
class _SlabBuilder:
    """Packs many small 2-D blocks into ONE lane-dense slab with static,
    sublane-aligned row offsets, so the kernel gets a single input ref
    (one DMA / one VMEM buffer) instead of many tiny ones."""

    def __init__(self, row_align):
        self.row_align = row_align
        self.rows = 0
        self.entries = []

    def add(self, arr):
        arr = np.asarray(arr, np.float32)
        assert arr.ndim == 2
        off = self.rows
        self.entries.append((off, arr))
        self.rows += -(-arr.shape[0] // self.row_align) * self.row_align
        return (int(off), int(arr.shape[0]), int(arr.shape[1]))

    def finalize(self, dtype):
        lanes = max(a.shape[1] for _, a in self.entries)
        lanes = -(-lanes // 128) * 128
        slab = np.zeros((max(self.rows, self.row_align), lanes), np.float32)
        for off, a in self.entries:
            slab[off:off + a.shape[0], :a.shape[1]] = a
        return jnp.asarray(slab, dtype)


def _pack_attn(al, ar):
    """Block attention matrix (H*F, 2H): feat_p @ A -> [el_0..el_{H-1} | er_0..er_{H-1}]."""
    H, F = al.shape
    a = np.zeros((H * F, 2 * H), np.float32)
    for h in range(H):
        a[h * F:(h + 1) * F, h] = al[h]
        a[h * F:(h + 1) * F, H + h] = ar[h]
    return a


def pack_gat_params(layer_params, norm_params, n_nodes):
    """One-time host packing: [w|wres] fusion, block attention matrices,
    broadcast / block-diagonal 0-1 constants, folded eval-mode BatchNorm, all
    concatenated into TWO slabs (bf16 matmul operands, f32 add vectors)."""
    n_layers = len(layer_params)
    N = n_nodes
    wb = _SlabBuilder(row_align=16)   # -> bf16 (matmul operands)
    vb = _SlabBuilder(row_align=8)    # -> f32  (bias / folded BN, exact adds)

    const_meta = {}
    for p in layer_params:
        key = (int(p["num_heads"]), int(p["out_feats"]))
        if key in const_meta:
            continue
        H, F = key
        eye_h = np.eye(H, dtype=np.float32)
        cm = dict(
            # src_eye[s, h*N+s'] = delta(s,s')  -> el row-broadcast via matmul
            src_eye=wb.add(np.kron(np.ones((1, H), np.float32),
                                   np.eye(N, dtype=np.float32))),
            # block_sum[h*N+s, h'] = delta(h,h') -> per-head softmax denominator
            block_sum=wb.add(np.kron(eye_h, np.ones((N, 1), np.float32))),
        )
        if H > 1:
            cm["expand_n"] = wb.add(np.kron(eye_h, np.ones((1, N), np.float32)))
            cm["expand_f"] = wb.add(np.kron(eye_h, np.ones((1, F), np.float32)))
            cm["bd_mask"] = wb.add(np.kron(eye_h, np.ones((N, F), np.float32)))
        const_meta[key] = cm

    meta = []
    for i, p in enumerate(layer_params):
        H, F = int(p["num_heads"]), int(p["out_feats"])
        identity_res = bool(p["identity_res"])
        w = np.asarray(p["w"], np.float32)
        if not identity_res:                      # fuse [w | w_res] into one matmul
            w = np.concatenate([w, np.asarray(p["wres"], np.float32)], axis=1)
        has_norm = i < n_layers - 1
        vecs = [np.asarray(p["b"], np.float32).reshape(1, -1)]
        if has_norm:                              # fold eval-mode BatchNorm
            g = norm_params[i]
            scale = np.asarray(g["gamma"], np.float32) / np.sqrt(
                np.asarray(g["var"], np.float32) + 1e-5)
            shift = (np.asarray(g["beta"], np.float32)
                     - np.asarray(g["mean"], np.float32) * scale)
            vecs += [scale.reshape(1, -1), shift.reshape(1, -1)]
        meta.append(dict(
            num_heads=H, out_feats=F, identity_res=identity_res, has_norm=has_norm,
            approx_recip=has_norm,   # exact reciprocal on the classifier layer
            w=wb.add(w),
            attn=wb.add(_pack_attn(np.asarray(p["al"], np.float32),
                                   np.asarray(p["ar"], np.float32))),
            vec=vb.add(np.concatenate(vecs, axis=0)),
        ))
    return dict(
        wslab=wb.finalize(jnp.bfloat16),
        vslab=vb.finalize(jnp.float32),
        meta=meta, const_meta=const_meta,
        max_heads=max(m["num_heads"] for m in meta),
        n_classes=int(layer_params[-1]["out_feats"]),
    )


# ----------------------------------------------------------------------------
# Fused Pallas kernel (built per network configuration)
# ----------------------------------------------------------------------------
def make_gat_kernel(meta, const_meta, n_nodes, max_heads):
    N = n_nodes
    BF = jnp.bfloat16
    F32 = jnp.float32

    def kernel(feat_ref, adj_ref, wslab_ref, vslab_ref, out_ref):
        def wget(ent):                       # bf16 matmul-operand slab
            off, r, c = ent
            return wslab_ref[off:off + r, 0:c]

        def vget(ent):                       # f32 bias / folded-BN slab
            off, r, c = ent
            return vslab_ref[off:off + r, 0:c]

        # int8 adjacency -> additive -1e9 mask, built ONCE at the widest head
        # count and sliced per layer (avoids per-layer f32 replication/compares).
        adjf = adj_ref[...].astype(F32)                          # (N, N) 0/1
        neg_full = (jnp.concatenate([adjf] * max_heads, axis=1) - 1.0) * 1e9
        ones_nn = jnp.ones((N, N), F32)      # lhs of the el row-broadcast matmul

        h = feat_ref[...]                                        # (N, F_in) f32
        for lm in meta:
            H, F = lm["num_heads"], lm["out_feats"]
            hd = H * F
            cm = const_meta[(H, F)]
            src_eye = wget(cm["src_eye"])                        # (N, H*N) 0/1
            block_sum = wget(cm["block_sum"])                    # (H*N, H) 0/1

            # ---- projection (+ residual projection fused into the same matmul)
            w_cat = wget(lm["w"])                                # bf16
            proj = jnp.dot(h.astype(BF), w_cat, preferred_element_type=F32)
            if lm["identity_res"]:
                feat_p, res = proj, h                            # DGL Identity residual
            else:
                feat_p, res = proj[:, :hd], proj[:, hd:]

            # ---- attention logits e = [el | er] (src / dst terms), f32
            attn = wget(lm["attn"])                              # (hd, 2H) bf16
            e = jnp.dot(feat_p, attn, preferred_element_type=F32)   # (N, 2H)
            el, er = e[:, :H], e[:, H:]
            # broadcast into the (N, H*N) lane-dense score layout with MXU
            # pushes (no (N,H)->(H,N) transpose, no per-head slice/concat loop)
            if H > 1:
                expand_n = wget(cm["expand_n"])                  # (H, H*N) 0/1
                er_b = jnp.dot(er, expand_n, preferred_element_type=F32)
                el_e = jnp.dot(el, expand_n, preferred_element_type=F32)
            else:
                er_b, el_e = er, el                              # (N,1): lane-broadcast below
            el_b = jnp.dot(ones_nn, el_e * src_eye, preferred_element_type=F32)
            s0 = er_b + el_b                                     # (N, H*N)
            s0 = jnp.where(s0 >= 0.0, s0, 0.2 * s0)              # LeakyReLU(0.2)
            scores = s0 + neg_full[:, :H * N]                    # -1e9 on non-edges

            # ---- per-head row max (numerical safety) + softmax numerator
            if H > 1:
                m_h = jnp.concatenate(
                    [jnp.max(scores[:, hh * N:(hh + 1) * N], axis=-1, keepdims=True)
                     for hh in range(H)], axis=1)                # (N, H)
                m_b = jnp.dot(m_h, expand_n, preferred_element_type=F32)
            else:
                m_b = jnp.max(scores, axis=-1, keepdims=True)
            p = jnp.exp(scores - m_b)          # masked entries underflow to exact 0
            p_b = p.astype(BF)

            # ---- per-head denominator + aggregation (one lane-dense matmul each)
            denom = jnp.dot(p_b, block_sum, preferred_element_type=F32)      # (N, H)
            inv = pl.reciprocal(denom, approx=lm["approx_recip"])
            if H > 1:
                expand_f = wget(cm["expand_f"])                              # (H, hd)
                inv_f = jnp.dot(inv, expand_f, preferred_element_type=F32)   # (N, hd)
                bd_mask = wget(cm["bd_mask"])                                # (H*N, hd)
                feat_bd = (jnp.concatenate([feat_p] * H, axis=0) * bd_mask).astype(BF)
            else:
                inv_f = inv                                                  # (N, 1)
                feat_bd = feat_p.astype(BF)
            agg = jnp.dot(p_b, feat_bd, preferred_element_type=F32)          # (N, hd)

            # ---- bias (+ folded eval-mode BatchNorm + ReLU between layers)
            vec = vget(lm["vec"])                                            # (1|3, hd) f32
            h = agg * inv_f + res + vec[0:1, :]
            if lm["has_norm"]:
                h = jnp.maximum(h * vec[1:2, :] + vec[2:3, :], 0.0)

        # final layer has a single head -> mean over heads is the identity
        out_ref[...] = h

    return kernel


# ----------------------------------------------------------------------------
# Wrapper
# ----------------------------------------------------------------------------
def gat_forward(feat, adj_i8, packed):
    """Full GAT forward in a single pallas_call (no grid, no pipelining)."""
    n = feat.shape[0]
    kernel = make_gat_kernel(packed["meta"], packed["const_meta"], n,
                             packed["max_heads"])
    vmem = pl.BlockSpec(memory_space=pltpu.MemorySpace.VMEM)
    return pl.pallas_call(
        kernel,
        out_shape=jax.ShapeDtypeStruct((n, packed["n_classes"]), jnp.float32),
        in_specs=[vmem, vmem, vmem, vmem],
        out_specs=vmem,
    )(feat, adj_i8, packed["wslab"], packed["vslab"])


# ----------------------------------------------------------------------------
# Deterministic setup + run
# ----------------------------------------------------------------------------
if __name__ == "__main__":
    N = 32            # nodes
    in_feats = 16
    n_hidden = 8
    n_classes = 8
    n_layers = 3
    n_heads = 4

    key = jax.random.PRNGKey(0)
    keys = iter(jax.random.split(key, 64))

    # node features
    feat = jax.random.normal(next(keys), (N, in_feats), dtype=jnp.float32)

    # synthetic graph: random edges + self-loops, adj[dst, src]; int8 for the kernel
    adj = (jax.random.uniform(next(keys), (N, N)) < 0.3).astype(jnp.float32)
    adj = jnp.clip(adj + jnp.eye(N, dtype=jnp.float32), 0.0, 1.0)
    adj_i8 = adj.astype(jnp.int8)

    layer_params = []
    norm_params = []
    for i in range(n_layers):
        in_hidden = n_heads * n_hidden if i > 0 else in_feats
        out_hidden = n_hidden if i < n_layers - 1 else n_classes
        num_heads = n_heads if i < n_layers - 1 else 1
        hd = num_heads * out_hidden
        w = jax.random.normal(next(keys), (in_hidden, hd), jnp.float32) * 0.2
        if in_hidden == hd:
            wres = jnp.eye(in_hidden, dtype=jnp.float32)   # DGL Identity residual
            identity_res = True
        else:
            wres = jax.random.normal(next(keys), (in_hidden, hd), jnp.float32) * 0.2
            identity_res = False
        al = jax.random.normal(next(keys), (num_heads, out_hidden), jnp.float32) * 0.2
        ar = jax.random.normal(next(keys), (num_heads, out_hidden), jnp.float32) * 0.2
        b = jax.random.normal(next(keys), (1, hd), jnp.float32) * 0.05
        layer_params.append(dict(w=w, wres=wres, al=al, ar=ar, b=b,
                                 num_heads=num_heads, out_feats=out_hidden,
                                 identity_res=identity_res))
        if i < n_layers - 1:
            c = n_heads * out_hidden
            norm_params.append(dict(
                gamma=1.0 + 0.1 * jax.random.normal(next(keys), (1, c), jnp.float32),
                beta=0.1 * jax.random.normal(next(keys), (1, c), jnp.float32),
                mean=0.1 * jax.random.normal(next(keys), (1, c), jnp.float32),
                var=jnp.abs(jax.random.normal(next(keys), (1, c), jnp.float32)) + 0.5,
            ))

    packed = pack_gat_params(layer_params, norm_params, N)   # one-time host packing
    out = gat_forward(feat, adj_i8, packed)
    out = jax.block_until_ready(out)
    assert out.shape == (N, n_classes)
    assert bool(jnp.all(jnp.isfinite(out)))
    print("KERNEL_OK")
</pallas_src>

<mosaic_0001>
module attributes {stable_mosaic.version = 11 : i64} {
  func.func @kernel(%arg0: memref<32x16xf32, #tpu.memory_space<vmem>>, %arg1: memref<32x32xi8, #tpu.memory_space<vmem>>, %arg2: memref<544x128xbf16, #tpu.memory_space<vmem>>, %arg3: memref<24x128xf32, #tpu.memory_space<vmem>>, %arg4: memref<32x8xf32, #tpu.memory_space<vmem>>) attributes {dimension_semantics = [], scalar_prefetch = 0 : i64, scratch_operands = 0 : i64, tpu.core_type = #tpu.core_type<tc>} {
    %c0 = arith.constant 0 : index
    %c0_0 = arith.constant 0 : index
    %0 = vector.load %arg1[%c0, %c0_0] : memref<32x32xi8, #tpu.memory_space<vmem>>, vector<32x32xi8>
    %1 = arith.sitofp %0 : vector<32x32xi8> to vector<32x32xf32>
    %2 = tpu.concatenate %1, %1, %1, %1 in 1 : vector<32x32xf32>, vector<32x32xf32>, vector<32x32xf32>, vector<32x32xf32> -> vector<32x128xf32>
    %cst = arith.constant 1.000000e+00 : f32
    %3 = vector.broadcast %cst : f32 to vector<32x128xf32>
    %4 = arith.subf %2, %3 : vector<32x128xf32>
    %cst_1 = arith.constant 1.000000e+09 : f32
    %5 = vector.broadcast %cst_1 : f32 to vector<32x128xf32>
    %6 = arith.mulf %4, %5 : vector<32x128xf32>
    %cst_2 = arith.constant 1.000000e+00 : f32
    %7 = vector.broadcast %cst_2 : f32 to vector<32x32xf32>
    %c0_3 = arith.constant 0 : index
    %c0_4 = arith.constant 0 : index
    %8 = vector.load %arg0[%c0_3, %c0_4] : memref<32x16xf32, #tpu.memory_space<vmem>>, vector<32x16xf32>
    %c0_5 = arith.constant 0 : index
    %c0_6 = arith.constant 0 : index
    %9 = vector.load %arg2[%c0_5, %c0_6] : memref<544x128xbf16, #tpu.memory_space<vmem>>, vector<32x128xbf16>
    %c32 = arith.constant 32 : index
    %c0_7 = arith.constant 0 : index
    %10 = vector.load %arg2[%c32, %c0_7] : memref<544x128xbf16, #tpu.memory_space<vmem>>, vector<128x4xbf16>
    %c384 = arith.constant 384 : index
    %c0_8 = arith.constant 0 : index
    %11 = vector.load %arg2[%c384, %c0_8] : memref<544x128xbf16, #tpu.memory_space<vmem>>, vector<16x64xbf16>
    %12 = arith.truncf %8 : vector<32x16xf32> to vector<32x16xbf16>
    %cst_9 = arith.constant dense<0.000000e+00> : vector<32x64xf32>
    %13 = tpu.matmul %12, %11, %cst_9 {dimension_numbers = #tpu.dot_dimension_numbers<[1], [0], [0], [1], [0, 0, 1, 1], [], []>} : vector<32x16xbf16>, vector<16x64xbf16>, vector<32x64xf32> -> vector<32x64xf32>
    %14 = vector.extract_strided_slice %13 {offsets = [0, 0], sizes = [32, 32], strides = [1, 1]} : vector<32x64xf32> to vector<32x32xf32>
    %15 = vector.extract_strided_slice %13 {offsets = [0, 32], sizes = [32, 32], strides = [1, 1]} : vector<32x64xf32> to vector<32x32xf32>
    %c400 = arith.constant 400 : index
    %c0_10 = arith.constant 0 : index
    %16 = vector.load %arg2[%c400, %c0_10] : memref<544x128xbf16, #tpu.memory_space<vmem>>, vector<32x8xbf16>
    %cst_11 = arith.constant dense<0.000000e+00> : vector<32x8xf32>
    %17 = tpu.matmul %14, %16, %cst_11 {dimension_numbers = #tpu.dot_dimension_numbers<[1], [0], [0], [1], [0, 0, 1, 1], [], []>} : vector<32x32xf32>, vector<32x8xbf16>, vector<32x8xf32> -> vector<32x8xf32>
    %18 = vector.extract_strided_slice %17 {offsets = [0, 0], sizes = [32, 4], strides = [1, 1]} : vector<32x8xf32> to vector<32x4xf32>
    %19 = vector.extract_strided_slice %17 {offsets = [0, 4], sizes = [32, 4], strides = [1, 1]} : vector<32x8xf32> to vector<32x4xf32>
    %c160 = arith.constant 160 : index
    %c0_12 = arith.constant 0 : index
    %20 = vector.load %arg2[%c160, %c0_12] : memref<544x128xbf16, #tpu.memory_space<vmem>>, vector<4x128xbf16>
    %cst_13 = arith.constant dense<0.000000e+00> : vector<32x128xf32>
    %21 = tpu.matmul %19, %20, %cst_13 {dimension_numbers = #tpu.dot_dimension_numbers<[1], [0], [0], [1], [0, 0, 1, 1], [], []>} : vector<32x4xf32>, vector<4x128xbf16>, vector<32x128xf32> -> vector<32x128xf32>
    %cst_14 = arith.constant dense<0.000000e+00> : vector<32x128xf32>
    %22 = tpu.matmul %18, %20, %cst_14 {dimension_numbers = #tpu.dot_dimension_numbers<[1], [0], [0], [1], [0, 0, 1, 1], [], []>} : vector<32x4xf32>, vector<4x128xbf16>, vector<32x128xf32> -> vector<32x128xf32>
    %23 = arith.extf %9 : vector<32x128xbf16> to vector<32x128xf32>
    %24 = arith.mulf %22, %23 : vector<32x128xf32>
    %cst_15 = arith.constant dense<0.000000e+00> : vector<32x128xf32>
    %25 = tpu.matmul %7, %24, %cst_15 {dimension_numbers = #tpu.dot_dimension_numbers<[1], [0], [0], [1], [0, 0, 1, 1], [], []>} : vector<32x32xf32>, vector<32x128xf32>, vector<32x128xf32> -> vector<32x128xf32>
    %26 = arith.addf %21, %25 : vector<32x128xf32>
    %cst_16 = arith.constant 0.000000e+00 : f32
    %27 = vector.broadcast %cst_16 : f32 to vector<32x128xf32>
    %28 = arith.cmpf oge, %26, %27 : vector<32x128xf32>
    %cst_17 = arith.constant 2.000000e-01 : f32
    %29 = vector.broadcast %cst_17 : f32 to vector<32x128xf32>
    %30 = arith.mulf %29, %26 : vector<32x128xf32>
    %31 = arith.select %28, %26, %30 : vector<32x128xi1>, vector<32x128xf32>
    %32 = arith.addf %31, %6 : vector<32x128xf32>
    %33 = vector.extract_strided_slice %32 {offsets = [0, 0], sizes = [32, 32], strides = [1, 1]} : vector<32x128xf32> to vector<32x32xf32>
    %cst_18 = arith.constant dense<0xFF800000> : vector<32xf32>
    %34 = vector.multi_reduction <maximumf>, %33, %cst_18 [1] : vector<32x32xf32> to vector<32xf32>
    %35 = vector.shape_cast %34 : vector<32xf32> to vector<32x1xf32>
    %36 = vector.extract_strided_slice %32 {offsets = [0, 32], sizes = [32, 32], strides = [1, 1]} : vector<32x128xf32> to vector<32x32xf32>
    %cst_19 = arith.constant dense<0xFF800000> : vector<32xf32>
    %37 = vector.multi_reduction <maximumf>, %36, %cst_19 [1] : vector<32x32xf32> to vector<32xf32>
    %38 = vector.shape_cast %37 : vector<32xf32> to vector<32x1xf32>
    %39 = vector.extract_strided_slice %32 {offsets = [0, 64], sizes = [32, 32], strides = [1, 1]} : vector<32x128xf32> to vector<32x32xf32>
    %cst_20 = arith.constant dense<0xFF800000> : vector<32xf32>
    %40 = vector.multi_reduction <maximumf>, %39, %cst_20 [1] : vector<32x32xf32> to vector<32xf32>
    %41 = vector.shape_cast %40 : vector<32xf32> to vector<32x1xf32>
    %42 = vector.extract_strided_slice %32 {offsets = [0, 96], sizes = [32, 32], strides = [1, 1]} : vector<32x128xf32> to vector<32x32xf32>
    %cst_21 = arith.constant dense<0xFF800000> : vector<32xf32>
    %43 = vector.multi_reduction <maximumf>, %42, %cst_21 [1] : vector<32x32xf32> to vector<32xf32>
    %44 = vector.shape_cast %43 : vector<32xf32> to vector<32x1xf32>
    %45 = tpu.concatenate %35, %38, %41, %44 in 1 : vector<32x1xf32>, vector<32x1xf32>, vector<32x1xf32>, vector<32x1xf32> -> vector<32x4xf32>
    %cst_22 = arith.constant dense<0.000000e+00> : vector<32x128xf32>
    %46 = tpu.matmul %45, %20, %cst_22 {dimension_numbers = #tpu.dot_dimension_numbers<[1], [0], [0], [1], [0, 0, 1, 1], [], []>} : vector<32x4xf32>, vector<4x128xbf16>, vector<32x128xf32> -> vector<32x128xf32>
    %47 = arith.subf %32, %46 : vector<32x128xf32>
    %48 = math.exp %47 : vector<32x128xf32>
    %49 = arith.truncf %48 : vector<32x128xf32> to vector<32x128xbf16>
    %cst_23 = arith.constant dense<0.000000e+00> : vector<32x4xf32>
    %50 = tpu.matmul %49, %10, %cst_23 {dimension_numbers = #tpu.dot_dimension_numbers<[1], [0], [0], [1], [0, 0, 1, 1], [], []>} : vector<32x128xbf16>, vector<128x4xbf16>, vector<32x4xf32> -> vector<32x4xf32>
    %51 = tpu.reciprocal %50 {approx = true} : vector<32x4xf32> -> vector<32x4xf32>
    %c176 = arith.constant 176 : index
    %c0_24 = arith.constant 0 : index
    %52 = vector.load %arg2[%c176, %c0_24] : memref<544x128xbf16, #tpu.memory_space<vmem>>, vector<4x32xbf16>
    %cst_25 = arith.constant dense<0.000000e+00> : vector<32x32xf32>
    %53 = tpu.matmul %51, %52, %cst_25 {dimension_numbers = #tpu.dot_dimension_numbers<[1], [0], [0], [1], [0, 0, 1, 1], [], []>} : vector<32x4xf32>, vector<4x32xbf16>, vector<32x32xf32> -> vector<32x32xf32>
    %c192 = arith.constant 192 : index
    %c0_26 = arith.constant 0 : index
    %54 = vector.load %arg2[%c192, %c0_26] : memref<544x128xbf16, #tpu.memory_space<vmem>>, vector<128x32xbf16>
    %55 = tpu.concatenate %14, %14, %14, %14 in 0 : vector<32x32xf32>, vector<32x32xf32>, vector<32x32xf32>, vector<32x32xf32> -> vector<128x32xf32>
    %56 = arith.extf %54 : vector<128x32xbf16> to vector<128x32xf32>
    %57 = arith.mulf %55, %56 : vector<128x32xf32>
    %58 = arith.truncf %57 : vector<128x32xf32> to vector<128x32xbf16>
    %cst_27 = arith.constant dense<0.000000e+00> : vector<32x32xf32>
    %59 = tpu.matmul %49, %58, %cst_27 {dimension_numbers = #tpu.dot_dimension_numbers<[1], [0], [0], [1], [0, 0, 1, 1], [], []>} : vector<32x128xbf16>, vector<128x32xbf16>, vector<32x32xf32> -> vector<32x32xf32>
    %c0_28 = arith.constant 0 : index
    %c0_29 = arith.constant 0 : index
    %60 = vector.load %arg3[%c0_28, %c0_29] : memref<24x128xf32, #tpu.memory_space<vmem>>, vector<3x32xf32>
    %61 = arith.mulf %59, %53 : vector<32x32xf32>
    %62 = arith.addf %61, %15 : vector<32x32xf32>
    %63 = vector.extract_strided_slice %60 {offsets = [0, 0], sizes = [1, 32], strides = [1, 1]} : vector<3x32xf32> to vector<1x32xf32>
    %64 = vector.broadcast %63 : vector<1x32xf32> to vector<32x32xf32>
    %65 = arith.addf %62, %64 : vector<32x32xf32>
    %66 = vector.extract_strided_slice %60 {offsets = [1, 0], sizes = [1, 32], strides = [1, 1]} : vector<3x32xf32> to vector<1x32xf32>
    %67 = vector.broadcast %66 : vector<1x32xf32> to vector<32x32xf32>
    %68 = arith.mulf %65, %67 : vector<32x32xf32>
    %69 = vector.extract_strided_slice %60 {offsets = [2, 0], sizes = [1, 32], strides = [1, 1]} : vector<3x32xf32> to vector<1x32xf32>
    %70 = vector.broadcast %69 : vector<1x32xf32> to vector<32x32xf32>
    %71 = arith.addf %68, %70 : vector<32x32xf32>
    %cst_30 = arith.constant 0.000000e+00 : f32
    %72 = vector.broadcast %cst_30 : f32 to vector<32x32xf32>
    %73 = arith.maximumf %71, %72 : vector<32x32xf32>
    %c0_31 = arith.constant 0 : index
    %c0_32 = arith.constant 0 : index
    %74 = vector.load %arg2[%c0_31, %c0_32] : memref<544x128xbf16, #tpu.memory_space<vmem>>, vector<32x128xbf16>
    %c32_33 = arith.constant 32 : index
    %c0_34 = arith.constant 0 : index
    %75 = vector.load %arg2[%c32_33, %c0_34] : memref<544x128xbf16, #tpu.memory_space<vmem>>, vector<128x4xbf16>
    %c432 = arith.constant 432 : index
    %c0_35 = arith.constant 0 : index
    %76 = vector.load %arg2[%c432, %c0_35] : memref<544x128xbf16, #tpu.memory_space<vmem>>, vector<32x32xbf16>
    %77 = arith.truncf %73 : vector<32x32xf32> to vector<32x32xbf16>
    %cst_36 = arith.constant dense<0.000000e+00> : vector<32x32xf32>
    %78 = tpu.matmul %77, %76, %cst_36 {dimension_numbers = #tpu.dot_dimension_numbers<[1], [0], [0], [1], [0, 0, 1, 1], [], []>} : vector<32x32xbf16>, vector<32x32xbf16>, vector<32x32xf32> -> vector<32x32xf32>
    %c464 = arith.constant 464 : index
    %c0_37 = arith.constant 0 : index
    %79 = vector.load %arg2[%c464, %c0_37] : memref<544x128xbf16, #tpu.memory_space<vmem>>, vector<32x8xbf16>
    %cst_38 = arith.constant dense<0.000000e+00> : vector<32x8xf32>
    %80 = tpu.matmul %78, %79, %cst_38 {dimension_numbers = #tpu.dot_dimension_numbers<[1], [0], [0], [1], [0, 0, 1, 1], [], []>} : vector<32x32xf32>, vector<32x8xbf16>, vector<32x8xf32> -> vector<32x8xf32>
    %81 = vector.extract_strided_slice %80 {offsets = [0, 0], sizes = [32, 4], strides = [1, 1]} : vector<32x8xf32> to vector<32x4xf32>
    %82 = vector.extract_strided_slice %80 {offsets = [0, 4], sizes = [32, 4], strides = [1, 1]} : vector<32x8xf32> to vector<32x4xf32>
    %c160_39 = arith.constant 160 : index
    %c0_40 = arith.constant 0 : index
    %83 = vector.load %arg2[%c160_39, %c0_40] : memref<544x128xbf16, #tpu.memory_space<vmem>>, vector<4x128xbf16>
    %cst_41 = arith.constant dense<0.000000e+00> : vector<32x128xf32>
    %84 = tpu.matmul %82, %83, %cst_41 {dimension_numbers = #tpu.dot_dimension_numbers<[1], [0], [0], [1], [0, 0, 1, 1], [], []>} : vector<32x4xf32>, vector<4x128xbf16>, vector<32x128xf32> -> vector<32x128xf32>
    %cst_42 = arith.constant dense<0.000000e+00> : vector<32x128xf32>
    %85 = tpu.matmul %81, %83, %cst_42 {dimension_numbers = #tpu.dot_dimension_numbers<[1], [0], [0], [1], [0, 0, 1, 1], [], []>} : vector<32x4xf32>, vector<4x128xbf16>, vector<32x128xf32> -> vector<32x128xf32>
    %86 = arith.extf %74 : vector<32x128xbf16> to vector<32x128xf32>
    %87 = arith.mulf %85, %86 : vector<32x128xf32>
    %cst_43 = arith.constant dense<0.000000e+00> : vector<32x128xf32>
    %88 = tpu.matmul %7, %87, %cst_43 {dimension_numbers = #tpu.dot_dimension_numbers<[1], [0], [0], [1], [0, 0, 1, 1], [], []>} : vector<32x32xf32>, vector<32x128xf32>, vector<32x128xf32> -> vector<32x128xf32>
    %89 = arith.addf %84, %88 : vector<32x128xf32>
    %cst_44 = arith.constant 0.000000e+00 : f32
    %90 = vector.broadcast %cst_44 : f32 to vector<32x128xf32>
    %91 = arith.cmpf oge, %89, %90 : vector<32x128xf32>
    %cst_45 = arith.constant 2.000000e-01 : f32
    %92 = vector.broadcast %cst_45 : f32 to vector<32x128xf32>
    %93 = arith.mulf %92, %89 : vector<32x128xf32>
    %94 = arith.select %91, %89, %93 : vector<32x128xi1>, vector<32x128xf32>
    %95 = arith.addf %94, %6 : vector<32x128xf32>
    %96 = vector.extract_strided_slice %95 {offsets = [0, 0], sizes = [32, 32], strides = [1, 1]} : vector<32x128xf32> to vector<32x32xf32>
    %cst_46 = arith.constant dense<0xFF800000> : vector<32xf32>
    %97 = vector.multi_reduction <maximumf>, %96, %cst_46 [1] : vector<32x32xf32> to vector<32xf32>
    %98 = vector.shape_cast %97 : vector<32xf32> to vector<32x1xf32>
    %99 = vector.extract_strided_slice %95 {offsets = [0, 32], sizes = [32, 32], strides = [1, 1]} : vector<32x128xf32> to vector<32x32xf32>
    %cst_47 = arith.constant dense<0xFF800000> : vector<32xf32>
    %100 = vector.multi_reduction <maximumf>, %99, %cst_47 [1] : vector<32x32xf32> to vector<32xf32>
    %101 = vector.shape_cast %100 : vector<32xf32> to vector<32x1xf32>
    %102 = vector.extract_strided_slice %95 {offsets = [0, 64], sizes = [32, 32], strides = [1, 1]} : vector<32x128xf32> to vector<32x32xf32>
    %cst_48 = arith.constant dense<0xFF800000> : vector<32xf32>
    %103 = vector.multi_reduction <maximumf>, %102, %cst_48 [1] : vector<32x32xf32> to vector<32xf32>
    %104 = vector.shape_cast %103 : vector<32xf32> to vector<32x1xf32>
    %105 = vector.extract_strided_slice %95 {offsets = [0, 96], sizes = [32, 32], strides = [1, 1]} : vector<32x128xf32> to vector<32x32xf32>
    %cst_49 = arith.constant dense<0xFF800000> : vector<32xf32>
    %106 = vector.multi_reduction <maximumf>, %105, %cst_49 [1] : vector<32x32xf32> to vector<32xf32>
    %107 = vector.shape_cast %106 : vector<32xf32> to vector<32x1xf32>
    %108 = tpu.concatenate %98, %101, %104, %107 in 1 : vector<32x1xf32>, vector<32x1xf32>, vector<32x1xf32>, vector<32x1xf32> -> vector<32x4xf32>
    %cst_50 = arith.constant dense<0.000000e+00> : vector<32x128xf32>
    %109 = tpu.matmul %108, %83, %cst_50 {dimension_numbers = #tpu.dot_dimension_numbers<[1], [0], [0], [1], [0, 0, 1, 1], [], []>} : vector<32x4xf32>, vector<4x128xbf16>, vector<32x128xf32> -> vector<32x128xf32>
    %110 = arith.subf %95, %109 : vector<32x128xf32>
    %111 = math.exp %110 : vector<32x128xf32>
    %112 = arith.truncf %111 : vector<32x128xf32> to vector<32x128xbf16>
    %cst_51 = arith.constant dense<0.000000e+00> : vector<32x4xf32>
    %113 = tpu.matmul %112, %75, %cst_51 {dimension_numbers = #tpu.dot_dimension_numbers<[1], [0], [0], [1], [0, 0, 1, 1], [], []>} : vector<32x128xbf16>, vector<128x4xbf16>, vector<32x4xf32> -> vector<32x4xf32>
    %114 = tpu.reciprocal %113 {approx = true} : vector<32x4xf32> -> vector<32x4xf32>
    %c176_52 = arith.constant 176 : index
    %c0_53 = arith.constant 0 : index
    %115 = vector.load %arg2[%c176_52, %c0_53] : memref<544x128xbf16, #tpu.memory_space<vmem>>, vector<4x32xbf16>
    %cst_54 = arith.constant dense<0.000000e+00> : vector<32x32xf32>
    %116 = tpu.matmul %114, %115, %cst_54 {dimension_numbers = #tpu.dot_dimension_numbers<[1], [0], [0], [1], [0, 0, 1, 1], [], []>} : vector<32x4xf32>, vector<4x32xbf16>, vector<32x32xf32> -> vector<32x32xf32>
    %c192_55 = arith.constant 192 : index
    %c0_56 = arith.constant 0 : index
    %117 = vector.load %arg2[%c192_55, %c0_56] : memref<544x128xbf16, #tpu.memory_space<vmem>>, vector<128x32xbf16>
    %118 = tpu.concatenate %78, %78, %78, %78 in 0 : vector<32x32xf32>, vector<32x32xf32>, vector<32x32xf32>, vector<32x32xf32> -> vector<128x32xf32>
    %119 = arith.extf %117 : vector<128x32xbf16> to vector<128x32xf32>
    %120 = arith.mulf %118, %119 : vector<128x32xf32>
    %121 = arith.truncf %120 : vector<128x32xf32> to vector<128x32xbf16>
    %cst_57 = arith.constant dense<0.000000e+00> : vector<32x32xf32>
    %122 = tpu.matmul %112, %121, %cst_57 {dimension_numbers = #tpu.dot_dimension_numbers<[1], [0], [0], [1], [0, 0, 1, 1], [], []>} : vector<32x128xbf16>, vector<128x32xbf16>, vector<32x32xf32> -> vector<32x32xf32>
    %c8 = arith.constant 8 : index
    %c0_58 = arith.constant 0 : index
    %123 = vector.load %arg3[%c8, %c0_58] : memref<24x128xf32, #tpu.memory_space<vmem>>, vector<3x32xf32>
    %124 = arith.mulf %122, %116 : vector<32x32xf32>
    %125 = arith.addf %124, %73 : vector<32x32xf32>
    %126 = vector.extract_strided_slice %123 {offsets = [0, 0], sizes = [1, 32], strides = [1, 1]} : vector<3x32xf32> to vector<1x32xf32>
    %127 = vector.broadcast %126 : vector<1x32xf32> to vector<32x32xf32>
    %128 = arith.addf %125, %127 : vector<32x32xf32>
    %129 = vector.extract_strided_slice %123 {offsets = [1, 0], sizes = [1, 32], strides = [1, 1]} : vector<3x32xf32> to vector<1x32xf32>
    %130 = vector.broadcast %129 : vector<1x32xf32> to vector<32x32xf32>
    %131 = arith.mulf %128, %130 : vector<32x32xf32>
    %132 = vector.extract_strided_slice %123 {offsets = [2, 0], sizes = [1, 32], strides = [1, 1]} : vector<3x32xf32> to vector<1x32xf32>
    %133 = vector.broadcast %132 : vector<1x32xf32> to vector<32x32xf32>
    %134 = arith.addf %131, %133 : vector<32x32xf32>
    %cst_59 = arith.constant 0.000000e+00 : f32
    %135 = vector.broadcast %cst_59 : f32 to vector<32x32xf32>
    %136 = arith.maximumf %134, %135 : vector<32x32xf32>
    %c320 = arith.constant 320 : index
    %c0_60 = arith.constant 0 : index
    %137 = vector.load %arg2[%c320, %c0_60] : memref<544x128xbf16, #tpu.memory_space<vmem>>, vector<32x32xbf16>
    %c352 = arith.constant 352 : index
    %c0_61 = arith.constant 0 : index
    %138 = vector.load %arg2[%c352, %c0_61] : memref<544x128xbf16, #tpu.memory_space<vmem>>, vector<32x1xbf16>
    %c496 = arith.constant 496 : index
    %c0_62 = arith.constant 0 : index
    %139 = vector.load %arg2[%c496, %c0_62] : memref<544x128xbf16, #tpu.memory_space<vmem>>, vector<32x16xbf16>
    %140 = arith.truncf %136 : vector<32x32xf32> to vector<32x32xbf16>
    %cst_63 = arith.constant dense<0.000000e+00> : vector<32x16xf32>
    %141 = tpu.matmul %140, %139, %cst_63 {dimension_numbers = #tpu.dot_dimension_numbers<[1], [0], [0], [1], [0, 0, 1, 1], [], []>} : vector<32x32xbf16>, vector<32x16xbf16>, vector<32x16xf32> -> vector<32x16xf32>
    %142 = vector.extract_strided_slice %141 {offsets = [0, 0], sizes = [32, 8], strides = [1, 1]} : vector<32x16xf32> to vector<32x8xf32>
    %143 = vector.extract_strided_slice %141 {offsets = [0, 8], sizes = [32, 8], strides = [1, 1]} : vector<32x16xf32> to vector<32x8xf32>
    %c528 = arith.constant 528 : index
    %c0_64 = arith.constant 0 : index
    %144 = vector.load %arg2[%c528, %c0_64] : memref<544x128xbf16, #tpu.memory_space<vmem>>, vector<8x2xbf16>
    %cst_65 = arith.constant dense<0.000000e+00> : vector<32x2xf32>
    %145 = tpu.matmul %142, %144, %cst_65 {dimension_numbers = #tpu.dot_dimension_numbers<[1], [0], [0], [1], [0, 0, 1, 1], [], []>} : vector<32x8xf32>, vector<8x2xbf16>, vector<32x2xf32> -> vector<32x2xf32>
    %146 = vector.extract_strided_slice %145 {offsets = [0, 0], sizes = [32, 1], strides = [1, 1]} : vector<32x2xf32> to vector<32x1xf32>
    %147 = vector.extract_strided_slice %145 {offsets = [0, 1], sizes = [32, 1], strides = [1, 1]} : vector<32x2xf32> to vector<32x1xf32>
    %148 = arith.extf %137 : vector<32x32xbf16> to vector<32x32xf32>
    %149 = vector.broadcast %146 : vector<32x1xf32> to vector<32x32xf32>
    %150 = arith.mulf %149, %148 : vector<32x32xf32>
    %cst_66 = arith.constant dense<0.000000e+00> : vector<32x32xf32>
    %151 = tpu.matmul %7, %150, %cst_66 {dimension_numbers = #tpu.dot_dimension_numbers<[1], [0], [0], [1], [0, 0, 1, 1], [], []>} : vector<32x32xf32>, vector<32x32xf32>, vector<32x32xf32> -> vector<32x32xf32>
    %152 = vector.broadcast %147 : vector<32x1xf32> to vector<32x32xf32>
    %153 = arith.addf %152, %151 : vector<32x32xf32>
    %cst_67 = arith.constant 0.000000e+00 : f32
    %154 = vector.broadcast %cst_67 : f32 to vector<32x32xf32>
    %155 = arith.cmpf oge, %153, %154 : vector<32x32xf32>
    %cst_68 = arith.constant 2.000000e-01 : f32
    %156 = vector.broadcast %cst_68 : f32 to vector<32x32xf32>
    %157 = arith.mulf %156, %153 : vector<32x32xf32>
    %158 = arith.select %155, %153, %157 : vector<32x32xi1>, vector<32x32xf32>
    %159 = vector.extract_strided_slice %6 {offsets = [0, 0], sizes = [32, 32], strides = [1, 1]} : vector<32x128xf32> to vector<32x32xf32>
    %160 = arith.addf %158, %159 : vector<32x32xf32>
    %cst_69 = arith.constant dense<0xFF800000> : vector<32xf32>
    %161 = vector.multi_reduction <maximumf>, %160, %cst_69 [1] : vector<32x32xf32> to vector<32xf32>
    %162 = vector.shape_cast %161 : vector<32xf32> to vector<32x1xf32>
    %163 = vector.broadcast %162 : vector<32x1xf32> to vector<32x32xf32>
    %164 = arith.subf %160, %163 : vector<32x32xf32>
    %165 = math.exp %164 : vector<32x32xf32>
    %166 = arith.truncf %165 : vector<32x32xf32> to vector<32x32xbf16>
    %cst_70 = arith.constant dense<0.000000e+00> : vector<32x1xf32>
    %167 = tpu.matmul %166, %138, %cst_70 {dimension_numbers = #tpu.dot_dimension_numbers<[1], [0], [0], [1], [0, 0, 1, 1], [], []>} : vector<32x32xbf16>, vector<32x1xbf16>, vector<32x1xf32> -> vector<32x1xf32>
    %168 = tpu.reciprocal %167 : vector<32x1xf32> -> vector<32x1xf32>
    %169 = arith.truncf %142 : vector<32x8xf32> to vector<32x8xbf16>
    %cst_71 = arith.constant dense<0.000000e+00> : vector<32x8xf32>
    %170 = tpu.matmul %166, %169, %cst_71 {dimension_numbers = #tpu.dot_dimension_numbers<[1], [0], [0], [1], [0, 0, 1, 1], [], []>} : vector<32x32xbf16>, vector<32x8xbf16>, vector<32x8xf32> -> vector<32x8xf32>
    %c16 = arith.constant 16 : index
    %c0_72 = arith.constant 0 : index
    %171 = vector.load %arg3[%c16, %c0_72] : memref<24x128xf32, #tpu.memory_space<vmem>>, vector<1x8xf32>
    %172 = vector.broadcast %168 : vector<32x1xf32> to vector<32x8xf32>
    %173 = arith.mulf %170, %172 : vector<32x8xf32>
    %174 = arith.addf %173, %143 : vector<32x8xf32>
    %175 = vector.broadcast %171 : vector<1x8xf32> to vector<32x8xf32>
    %176 = arith.addf %174, %175 : vector<32x8xf32>
    %c0_73 = arith.constant 0 : index
    %c0_74 = arith.constant 0 : index
    %177 = vector.load %arg4[%c0_73, %c0_74] : memref<32x8xf32, #tpu.memory_space<vmem>>, vector<32x8xf32>
    tpu.vector_store %arg4[%c0_73, %c0_74], %176 {strides = array<i32>} : memref<32x8xf32, #tpu.memory_space<vmem>>, vector<32x8xf32>,
    return
  }
}

</mosaic_0001>

<bundles_post_ra>
// kernel: tpu_custom_call.1
= control target key start
LH: loop header
LB: loop body
LE: loop exit
PB: predicated region body
PF: predicated region fallthrough
CT: control target
= control target key end

     0   :  { %9 = vsyncpa [#allocation3], 0  ;;  %s1830_s18 = smov [#allocation2]   ;;  %s1831_s20 = smov 64   ;;  %s2379_s0 = inlined_call_operand.vmem [shape: f32[32,16], index: 0, kind: input, shape index: {}]   ;;  %s2380_s1 = inlined_call_operand.vmem [shape: s8[32,32], index: 1, kind: input, shape index: {}]   ;;  %s2381_s2 = inlined_call_operand.hbm [shape: bf16[544,128], index: 2, kind: input, shape index: {}]   ;;  %s2382_s3 = inlined_call_operand.vmem [shape: f32[24,128], index: 3, kind: input, shape index: {}]   ;;  %s2383_s4 = inlined_call_operand.vmem [shape: f32[32,8], index: 4, kind: output, shape index: {}]  }
   0x1   :  { %s18_s17 = sshll.u32 %s2381_s2, 4  ;;  %s20_s19 = sshll.u32 %s1830_s18, 4  ;;  %s19_s17 = int_to_ptr.hbm [resolvable:$true] %s18_s17  ;;  %s21_s19 = int_to_ptr.vmem [resolvable:$true] %s20_s19 }
   0x2   :  { %s1832_s21 = smov 4  }
   0x3   :  { %26 = dma.hbm_to_vmem [thread:$0]  %s19_s17, 4352, %s21_s19, [#allocation3], %s1831_s20, %s1831_s20, %s1832_s21  }
   0x4   :  { %1828 = dma.done.wait [#allocation3], 4352  }
   0x5   :  { %1829 = vsyncadd [#allocation3], 4294962944  ;;  %v1660_v0 = vld [vmem:[#allocation2 + $0xc0] sm:$0xff]  ;;  %v107_v2 = vld [vmem:[%s2379_s0 + $0x8] sm:$0xff]  ;;  %vm140_vm0 = vcmask 130048   ;;  %vm229_vm1 = vcmask 1041408  }
   0x6   :  { %v106_v1 = vld [vmem:[%s2379_s0] sm:$0xff]  ;;  %v1662_v4 = vld [vmem:[#allocation2 + $0xd0] sm:$0xff]  ;;  %154 = vmatpush.bf16.msra.mxu0 %v1660_v0  ;;  %v1661_v5 = vld [vmem:[#allocation2 + $0xc8] sm:$0xff]  ;;  %vm83_vm2 = vcmask 261120   ;;  %vm216_vm3 = vcmask 31744   ;;  %s1834_s5 = smov 96  }
   0x7   :  { %v132_v3 = vpack.c.bf16 %v107_v2, %v106_v1  ;;  %200 = vmatpush.bf16.msra.mxu1 %v1662_v4  ;;  %v108_v6 = vld [vmem:[%s2379_s0 + $0x10] sm:$0xff]  ;;  %v109_v7 = vld [vmem:[%s2379_s0 + $0x18] sm:$0xff]  ;;  %v1918_v23 = vld [vmem:[#allocation2 + $0x88] sm:$0xff]   ;;  %s1833_s0 = smov 124   ;;  %s1835_s6 = smov 32   ;;  %vm88_vm4 = vcmask 523264  }
   0x8   :  { %v133_v8 = vpack.c.bf16 %v109_v7, %v108_v6  ;;  %v215_v9 = vld [vmem:[#allocation2 + $0x50] sm:$0x3]  ;;  %v1900_v14 = vld [vmem:[#allocation2 + $0x98] sm:$0xff]   ;;  %v1702_v26 = vunpack.c.h.bf16 %v1918_v23  ;;  %v1701_v28 = vunpack.c.l.bf16 %v1918_v23  ;;  %v1928_v29 = vld [vmem:[#allocation2 + $0x80] sm:$0xff]   ;;  %vm93_vm5 = vcmask 785408   ;;  %s1839_s10 = smov 120  }
   0x9   :  { %1514 = vmatmul.msk.bf16.vlgmr.msra.gmra.mxu0 %vm140_vm0, %v132_v3  ;;  %v1883_v10 = vsel %vm229_vm1, %v215_v9, 0  ;;  %v1709_v15 = vunpack.c.l.bf16 %v1900_v14  ;;  %v1710_v16 = vunpack.c.h.bf16 %v1900_v14  ;;  %v1904_v17 = vld [vmem:[#allocation2 + $0x90] sm:$0xff]   ;;  %v1698_v32 = vunpack.c.h.bf16 %v1928_v29  ;;  %v1938_v35 = vld [vmem:[#allocation2 + $0x78] sm:$0xff]   ;;  %v1958_v47 = vld [vmem:[#allocation2 + $0x68] sm:$0xff]  }
   0xa   :  { %317 = vmatpush.bf16.msrb.mxu0 %v1883_v10  ;;  %240 = vmatpush.bf16.msra.mxu2 %v1883_v10  ;;  %v1706_v18 = vunpack.c.h.bf16 %v1904_v17  ;;  %v1705_v22 = vunpack.c.l.bf16 %v1904_v17  ;;  %v1697_v34 = vunpack.c.l.bf16 %v1928_v29  ;;  %v1694_v38 = vunpack.c.h.bf16 %v1938_v35  ;;  %v1948_v41 = vld [vmem:[#allocation2 + $0x70] sm:$0xff]   ;;  %v1968_v53 = vld [vmem:[#allocation2 + $0x60] sm:$0xff]  }
   0xb   :  { %201 = vmatpush.bf16.msra.mxu1 %v1661_v5  ;;  %v1693_v40 = vunpack.c.l.bf16 %v1938_v35  ;;  %v1690_v44 = vunpack.c.h.bf16 %v1948_v41  ;;  %v1689_v46 = vunpack.c.l.bf16 %v1948_v41  ;;  %v1686_v50 = vunpack.c.h.bf16 %v1958_v47 }
   0xc   :  { %v1685_v52 = vunpack.c.l.bf16 %v1958_v47  ;;  %v1682_v56 = vunpack.c.h.bf16 %v1968_v53  ;;  %v1681_v58 = vunpack.c.l.bf16 %v1968_v53  ;;  %vm372_vm7 = vcmask 785920  }
   0xd   :  { %vm359_vm8 = vcmask 523520   ;;  %vm385_vm10 = vcmask 1048320   ;;  %vm398_vm13 = vcmask 7168   ;;  %vm403_vm14 = vcmask 15360  }
   0xe   :  { %432 = vmatpush.bf16.msrb.mxu2 %v1883_v10  ;;  %vm408_vm15 = vcmask 23552  }
  0x19   :  { %1515 = vmatmul.msk.bf16.gmra.mxu0 %vm140_vm0, %v133_v8  ;;  %v34_v8 = vld [vmem:[%s2380_s1] sm:$0xff] }
  0x86   :  { %v1888_v11 = vpop.f32.mrf.mxu0 }
  0x87   :  { %1524 = vmatmul.msk.f32.vlgmr.msra.gmra.mxu1 %vm83_vm2, %v1888_v11  ;;  %v612_v27 = vmul.f32 %v1705_v22, %v1888_v11  ;;  %v608_v39 = vmul.f32 %v1697_v34, %v1888_v11  ;;  %v604_v51 = vmul.f32 %v1689_v46, %v1888_v11  ;;  %v600_v61 = vmul.f32 %v1681_v58, %v1888_v11 }
  0x8e   :  { %v1892_v12 = vpop.f32.mrf.mxu0 }
  0x8f   :  { %1525 = vmatmul.msk.f32.gmra.mxu1 %vm83_vm2, %v1892_v12  ;;  %v613_v25 = vmul.f32 %v1706_v18, %v1892_v12  ;;  %v609_v37 = vmul.f32 %v1698_v32, %v1892_v12  ;;  %v605_v49 = vmul.f32 %v1690_v44, %v1892_v12  ;;  %v601_v60 = vmul.f32 %v1682_v56, %v1892_v12 }
  0x91   :  { %v622_v30 = vpack.c.bf16 %v613_v25, %v612_v27  ;;  %v620_v42 = vpack.c.bf16 %v609_v37, %v608_v39  ;;  %v618_v54 = vpack.c.bf16 %v605_v49, %v604_v51  ;;  %v616_v62 = vpack.c.bf16 %v601_v60, %v600_v61  ;;  %v2001_v27 = vld [vmem:[#allocation2 + $0x8] sm:$0xff]  }
  0x92   :  { %v36_v25 = vunpack.c.1.s8 %v34_v8 }
  0x96   :  { %v1896_v13 = vpop.f32.mrf.mxu0 }
  0x97   :  { %1526 = vmatmul.msk.f32.gmra.mxu1 %vm83_vm2, %v1896_v13  ;;  %v614_v20 = vmul.f32 %v1709_v15, %v1896_v13  ;;  %v610_v33 = vmul.f32 %v1701_v28, %v1896_v13  ;;  %v606_v45 = vmul.f32 %v1693_v40, %v1896_v13  ;;  %v602_v57 = vmul.f32 %v1685_v52, %v1896_v13 }
  0x9e   :  { %v1907_v19 = vpop.f32.mrf.mxu0 }
  0x9f   :  { %1527 = vmatmul.msk.f32.gmra.mxu1 %vm83_vm2, %v1907_v19  ;;  %v615_v21 = vmul.f32 %v1710_v16, %v1907_v19  ;;  %v611_v31 = vmul.f32 %v1702_v26, %v1907_v19  ;;  %v607_v43 = vmul.f32 %v1694_v38, %v1907_v19  ;;  %v603_v55 = vmul.f32 %v1686_v50, %v1907_v19 }
  0xa1   :  { %v623_v24 = vpack.c.bf16 %v615_v21, %v614_v20  ;;  %v621_v36 = vpack.c.bf16 %v611_v31, %v610_v33  ;;  %v619_v48 = vpack.c.bf16 %v607_v43, %v606_v45  ;;  %v617_v59 = vpack.c.bf16 %v603_v55, %v602_v57 }
  0xa2   :  { %v35_v20 = vunpack.c.0.s8 %v34_v8  ;;  %v1678_v31 = vunpack.c.h.bf16 %v2001_v27  ;;  %v1677_v33 = vunpack.c.l.bf16 %v2001_v27  ;;  %v37_v43 = vunpack.c.2.s8 %v34_v8 }
  0xa3   :  { %624 = vmatpush.bf16.msra.mxu0 %v623_v24  ;;  %v1836_v57 = vmov 1.0  }
  0xa4   :  { %v39_v21 = vcvt.s32.f32 %v35_v20  ;;  %v41_v49 = vcvt.s32.f32 %v37_v43 }
  0xa6   :  { %47 = vrot.lane.b32.xlu2 %v39_v21, %s1835_s6 }
  0xa7   :  { %625 = vmatpush.bf16.msra.mxu0 %v622_v30  ;;  %v40_v30 = vcvt.s32.f32 %v36_v25 }
  0xab   :  { %626 = vmatpush.bf16.msra.mxu0 %v621_v36  ;;  %v2008_v36 = vld [vmem:[#allocation2] sm:$0xff]  }
  0xac   :  { %v1674_v39 = vunpack.c.h.bf16 %v2008_v36  ;;  %v1673_v45 = vunpack.c.l.bf16 %v2008_v36 }
  0xae   :  { %59 = vrot.lane.b32.xlu2 %v39_v21, %s1831_s20 }
  0xaf   :  { %627 = vmatpush.bf16.msra.mxu0 %v620_v42 }
  0xb3   :  { %628 = vmatpush.bf16.msra.mxu0 %v619_v48 }
  0xb6   :  { %61 = vrot.lane.b32.xlu2 %v40_v30, %s1831_s20 }
  0xb7   :  { %629 = vmatpush.bf16.msra.mxu0 %v618_v54  ;;  %v38_v54 = vunpack.c.3.s8 %v34_v8 }
  0xbb   :  { %630 = vmatpush.bf16.msra.mxu0 %v617_v59  ;;  %v42_v59 = vcvt.s32.f32 %v38_v54 }
  0xbe   :  { %63 = vrot.lane.b32.xlu2 %v41_v49, %s1831_s20 }
  0xbf   :  { %631 = vmatpush.bf16.msra.mxu0 %v616_v62 }
  0xc6   :  { %65 = vrot.lane.b32.xlu2 %v42_v59, %s1831_s20 }
 0x100   :  { %v48_v60 = vpop.permute.xlu2 %47 }
 0x104   :  { %v203_v63 = vpop.f32.mrf.mxu1 }
 0x105   :  { %294 = vrot.lane.b32.xlu0 %v203_v63, %s1833_s0  ;;  %1528 = vmatmul.msk.f32.vlgmr.msra.gmra.mxu2 %vm216_vm3, %v203_v63 }
 0x108   :  { %v60_v61 = vpop.permute.xlu2 %59 }
 0x10c   :  { %v206_v0 = vpop.f32.mrf.mxu1 }
 0x10d   :  { %296 = vrot.lane.b32.xlu0 %v206_v0, %s1833_s0  ;;  %1529 = vmatmul.msk.f32.gmra.mxu2 %vm216_vm3, %v206_v0  ;;  %v84_v0 = vsel %vm83_vm2, %v39_v21, %v48_v60 }
 0x114   :  { %v209_v1 = vpop.f32.mrf.mxu1 }
 0x115   :  { %298 = vrot.lane.b32.xlu1 %v209_v1, %s1833_s0  ;;  %1530 = vmatmul.msk.f32.gmra.mxu2 %vm216_vm3, %v209_v1  ;;  %v62_v1 = vpop.permute.xlu2 %61 }
 0x116   :  { %71 = vrot.lane.b32.xlu0 %v39_v21, %s1834_s5 }
 0x11c   :  { %v212_v2 = vpop.f32.mrf.mxu1 }
 0x11d   :  { %300 = vrot.lane.b32.xlu1 %v212_v2, %s1833_s0  ;;  %1531 = vmatmul.msk.f32.gmra.mxu2 %vm216_vm3, %v212_v2 }
 0x11e   :  { %73 = vrot.lane.b32.xlu0 %v40_v30, %s1834_s5 }
 0x125   :  { %49 = vrot.lane.b32.xlu1 %v40_v30, %s1835_s6 }
 0x126   :  { %75 = vrot.lane.b32.xlu0 %v41_v49, %s1834_s5 }
 0x12d   :  { %51 = vrot.lane.b32.xlu1 %v41_v49, %s1835_s6 }
 0x12e   :  { %77 = vrot.lane.b32.xlu0 %v42_v59, %s1834_s5 }
 0x135   :  { %53 = vrot.lane.b32.xlu1 %v42_v59, %s1835_s6 }
 0x177   :  { %v295_v3 = vpop.permute.xlu0 %294 }
 0x178   :  { %1536 = vmatmul.msk.f32.vlgmr.msrb.gmra.mxu0 %vm216_vm3, %v295_v3  ;;  %v89_v3 = vsel %vm88_vm4, %v84_v0, %v60_v61 }
 0x17f   :  { %v297_v4 = vpop.permute.xlu0 %296 }
 0x180   :  { %1537 = vmatmul.msk.f32.gmra.mxu0 %vm216_vm3, %v297_v4 }
 0x187   :  { %v299_v5 = vpop.permute.xlu1 %298 }
 0x188   :  { %v242_v6 = vpop.f32.mrf.mxu2  ;;  %1538 = vmatmul.msk.f32.gmra.mxu0 %vm216_vm3, %v299_v5  ;;  %v72_v62 = vpop.permute.xlu0 %71 }
 0x189   :  { %v258_v55 = vmul.f32 %v1673_v45, %v242_v6  ;;  %v94_v5 = vsel %vm93_vm5, %v89_v3, %v72_v62 }
 0x18f   :  { %v301_v7 = vpop.permute.xlu1 %300 }
 0x190   :  { %v245_v9 = vpop.f32.mrf.mxu2  ;;  %1539 = vmatmul.msk.f32.gmra.mxu0 %vm216_vm3, %v301_v7  ;;  %v74_v4 = vpop.permute.xlu0 %73  ;;  %v1506_v7 = vadd.f32 -1.0, %v94_v5 }
 0x191   :  { %v259_v51 = vmul.f32 %v1674_v39, %v245_v9 }
 0x192   :  { %v2041_v43 = vmul.f32 1e+09, %v1506_v7 }
 0x197   :  { %v50_v63 = vpop.permute.xlu1 %49 }
 0x198   :  { %v248_v24 = vpop.f32.mrf.mxu2  ;;  %v85_v6 = vsel %vm83_vm2, %v40_v30, %v50_v63 }
 0x199   :  { %v260_v48 = vmul.f32 %v1677_v33, %v248_v24  ;;  %v90_v9 = vsel %vm88_vm4, %v85_v6, %v62_v1 }
 0x19a   :  { %v95_v21 = vsel %vm93_vm5, %v90_v9, %v74_v4 }
 0x19b   :  { %v1507_v54 = vadd.f32 -1.0, %v95_v21 }
 0x19f   :  { %v52_v20 = vpop.permute.xlu1 %51 }
 0x1a0   :  { %v251_v37 = vpop.f32.mrf.mxu2 }
 0x1a1   :  { %v261_v42 = vmul.f32 %v1678_v31, %v251_v37  ;;  %v64_v37 = vpop.permute.xlu2 %63 }
 0x1a3   :  { %277 = vmatpush.msra.mxu3 %v261_v42 }
 0x1a5   :  { %278 = vmatpush.msra.mxu3 %v260_v48 }
 0x1a7   :  { %279 = vmatpush.msra.mxu3 %v259_v51  ;;  %v86_v51 = vsel %vm83_vm2, %v41_v49, %v52_v20  ;;  %v2054_v49 = vmul.f32 1e+09, %v1507_v54 }
 0x1a8   :  { %v91_v0 = vsel %vm88_vm4, %v86_v51, %v64_v37 }
 0x1a9   :  { %280 = vmatpush.msra.mxu3 %v258_v55  ;;  %v76_v55 = vpop.permute.xlu0 %75  ;;  %v66_v7 = vpop.permute.xlu2 %65 }
 0x1aa   :  { %1532 = vmatmul.msk.f32.vlgmr.msra.gmra.mxu3 %vm83_vm2, %v1836_v57  ;;  %v96_v4 = vsel %vm93_vm5, %v91_v0, %v76_v55 }
 0x1ab   :  { %v1508_v20 = vadd.f32 -1.0, %v96_v4 }
 0x1ad   :  { %v2068_v51 = vmul.f32 1e+09, %v1508_v20 }
 0x1b2   :  { %1533 = vmatmul.msk.f32.gmra.mxu3 %vm83_vm2, %v1836_v57 }
 0x1ba   :  { %1534 = vmatmul.msk.f32.gmra.mxu3 %vm83_vm2, %v1836_v57 }
 0x1c2   :  { %1535 = vmatmul.msk.f32.gmra.mxu3 %vm83_vm2, %v1836_v57 }
 0x1f5   :  { %v319_v2 = vpop.f32.mrf.mxu0 }
 0x1fd   :  { %v322_v42 = vpop.f32.mrf.mxu0 }
 0x22d   :  { %v282_v8 = vpop.f32.mrf.mxu3 }
 0x22e   :  { %v320_v24 = vadd.f32 %v319_v2, %v282_v8  ;;  %v54_v2 = vpop.permute.xlu1 %53  ;;  %v325_v8 = vpop.f32.mrf.mxu0 }
 0x22f   :  { %v87_v6 = vsel %vm83_vm2, %v42_v59, %v54_v2 }
 0x230   :  { %vm331_vm6 = vcmp.ge.f32.partialorder %v320_v24, 0.0  ;;  %v335_v25 = vmul.f32 0.2, %v320_v24 }
 0x232   :  { %v339_v48 = vsel %vm331_vm6, %v320_v24, %v335_v25  ;;  %vm1180_vm6 = vcmask 64512  }
 0x233   :  { %v2045_v30 = vadd.f32 %v339_v48, %v2041_v43  ;;  %v78_v48 = vpop.permute.xlu0 %77 }
 0x235   :  { %v285_v60 = vpop.f32.mrf.mxu3  ;;  %v373_v61 = vsel %vm372_vm7, %v2045_v30, -inf  ;;  %v360_v62 = vsel %vm359_vm8, %v2045_v30, -inf  ;;  %v347_v63 = vsel %vm83_vm2, %v2045_v30, -inf  ;;  %v386_v25 = vsel %vm385_vm10, %v2045_v30, -inf }
 0x236   :  { %v323_v1 = vadd.f32 %v322_v42, %v285_v60  ;;  %374 = vmax.xlane.f32.xlu0 %v373_v61  ;;  %361 = vmax.xlane.f32.xlu2 %v360_v62  ;;  %v92_v42 = vsel %vm88_vm4, %v87_v6, %v66_v7 }
 0x237   :  { %348 = vmax.xlane.f32.xlu1 %v347_v63  ;;  %v97_v55 = vsel %vm93_vm5, %v92_v42, %v78_v48  ;;  %v328_v63 = vpop.f32.mrf.mxu0 }
 0x238   :  { %vm332_vm9 = vcmp.ge.f32.partialorder %v323_v1, 0.0  ;;  %v336_v3 = vmul.f32 0.2, %v323_v1  ;;  %v1509_v62 = vadd.f32 -1.0, %v97_v55 }
 0x23a   :  { %v340_v5 = vsel %vm332_vm9, %v323_v1, %v336_v3 }
 0x23b   :  { %v2059_v9 = vadd.f32 %v340_v5, %v2054_v49  ;;  %v2080_v5 = vmul.f32 1e+09, %v1509_v62 }
 0x23d   :  { %v288_v24 = vpop.f32.mrf.mxu3  ;;  %v376_v21 = vsel %vm372_vm7, %v2059_v9, -inf  ;;  %v350_v37 = vsel %vm83_vm2, %v2059_v9, -inf  ;;  %v363_v1 = vsel %vm359_vm8, %v2059_v9, -inf  ;;  %v389_v4 = vsel %vm385_vm10, %v2059_v9, -inf }
 0x23e   :  { %v326_v59 = vadd.f32 %v325_v8, %v288_v24  ;;  %387 = vmax.xlane.f32.xlu2 %v386_v25  ;;  %377 = vmax.xlane.f32.xlu0 %v376_v21 }
 0x23f   :  { %351 = vmax.xlane.f32.xlu1 %v350_v37 }
 0x240   :  { %vm333_vm11 = vcmp.ge.f32.partialorder %v326_v59, 0.0  ;;  %v337_v54 = vmul.f32 0.2, %v326_v59 }
 0x242   :  { %v341_v60 = vsel %vm333_vm11, %v326_v59, %v337_v54 }
 0x243   :  { %v2072_v61 = vadd.f32 %v341_v60, %v2068_v51 }
 0x245   :  { %v291_v0 = vpop.f32.mrf.mxu3  ;;  %v366_v2 = vsel %vm359_vm8, %v2072_v61, -inf  ;;  %v353_v20 = vsel %vm83_vm2, %v2072_v61, -inf  ;;  %v379_v25 = vsel %vm372_vm7, %v2072_v61, -inf  ;;  %v392_v21 = vsel %vm385_vm10, %v2072_v61, -inf }
 0x246   :  { %v329_v3 = vadd.f32 %v328_v63, %v291_v0  ;;  %364 = vmax.xlane.f32.xlu2 %v363_v1  ;;  %367 = vmax.xlane.f32.xlu0 %v366_v2 }
 0x247   :  { %390 = vmax.xlane.f32.xlu1 %v389_v4 }
 0x248   :  { %vm334_vm12 = vcmp.ge.f32.partialorder %v329_v3, 0.0  ;;  %v338_v6 = vmul.f32 0.2, %v329_v3 }
 0x24a   :  { %v342_v7 = vsel %vm334_vm12, %v329_v3, %v338_v6 }
 0x24b   :  { %v2083_v8 = vadd.f32 %v342_v7, %v2080_v5 }
 0x24d   :  { %v356_v24 = vsel %vm83_vm2, %v2083_v8, -inf  ;;  %v395_v37 = vsel %vm385_vm10, %v2083_v8, -inf  ;;  %v369_v42 = vsel %vm359_vm8, %v2083_v8, -inf  ;;  %v382_v48 = vsel %vm372_vm7, %v2083_v8, -inf }
 0x24e   :  { %354 = vmax.xlane.f32.xlu2 %v353_v20  ;;  %357 = vmax.xlane.f32.xlu0 %v356_v24 }
 0x24f   :  { %380 = vmax.xlane.f32.xlu1 %v379_v25 }
 0x256   :  { %393 = vmax.xlane.f32.xlu2 %v392_v21  ;;  %396 = vmax.xlane.f32.xlu0 %v395_v37 }
 0x257   :  { %370 = vmax.xlane.f32.xlu1 %v369_v42  ;;  %v2118_v42 = vld [vmem:[#allocation2 + $0x48] sm:$0xff] }
 0x258   :  { %508 = vmatpush.bf16.msrb.mxu1 %v2118_v42  ;;  %1730 = vmatpush.bf16.msrb.mxu3 %v2118_v42 }
 0x25e   :  { %383 = vmax.xlane.f32.xlu2 %v382_v48  ;;  %v2122_v48 = vld [vmem:[#allocation2 + $0x40] sm:$0xff] }
 0x25f   :  { %509 = vmatpush.bf16.msrb.mxu1 %v2122_v48  ;;  %1731 = vmatpush.bf16.msrb.mxu3 %v2122_v48 }
 0x26a   :  { %652 = vrot.lane.b32.xlu0 %v1896_v13, %s1834_s5 }
 0x270   :  { %648 = vrot.lane.b32.xlu1 %v1888_v11, %s1834_s5 }
 0x276   :  { %650 = vrot.lane.b32.xlu2 %v1892_v12, %s1834_s5 }
 0x278   :  { %654 = vrot.lane.b32.xlu1 %v1907_v19, %s1834_s5 }
 0x2a9   :  { %v362_v59 = vpop.xlane.xlu2 %361  ;;  %v375_v54 = vpop.xlane.xlu0 %374 }
 0x2aa   :  { %v349_v55 = vpop.xlane.xlu1 %348 }
 0x2ab   :  { %v399_v60 = vsel %vm398_vm13, %v349_v55, %v362_v59 }
 0x2ac   :  { %v404_v62 = vsel %vm403_vm14, %v399_v60, %v375_v54 }
 0x2b1   :  { %v388_v13 = vpop.xlane.xlu2 %387  ;;  %v378_v12 = vpop.xlane.xlu0 %377 }
 0x2b2   :  { %v352_v63 = vpop.xlane.xlu1 %351  ;;  %v409_v11 = vsel %vm408_vm15, %v404_v62, %v388_v13 }
 0x2b3   :  { %1540 = vmatmul.msk.f32.vlgmr.msrb.gmra.mxu2 %vm216_vm3, %v409_v11  ;;  %v1656_v11 = vld [vmem:[#allocation2 + $0x30] sm:$0xff] }
 0x2b9   :  { %v365_v0 = vpop.xlane.xlu2 %364  ;;  %v368_v4 = vpop.xlane.xlu0 %367 }
 0x2ba   :  { %v391_v1 = vpop.xlane.xlu1 %390  ;;  %v400_v19 = vsel %vm398_vm13, %v352_v63, %v365_v0  ;;  %v1657_v63 = vld [vmem:[#allocation2 + $0x38] sm:$0xff]  ;;  %v1654_v0 = vld [vmem:[#allocation2 + $0x20] sm:$0xff] }
 0x2bb   :  { %v405_v2 = vsel %vm403_vm14, %v400_v19, %v378_v12  ;;  %510 = vmatpush.bf16.msrb.mxu1 %v1657_v63  ;;  %1732 = vmatpush.bf16.msrb.mxu3 %v1657_v63  ;;  %v1655_v12 = vld [vmem:[#allocation2 + $0x28] sm:$0xff]  ;;  %v1652_v19 = vld [vmem:[#allocation2 + $0x10] sm:$0xff] }
 0x2bc   :  { %v410_v3 = vsel %vm408_vm15, %v405_v2, %v391_v1  ;;  %v1653_v1 = vld [vmem:[#allocation2 + $0x18] sm:$0xff] }
 0x2bd   :  { %1541 = vmatmul.msk.f32.gmra.mxu2 %vm216_vm3, %v410_v3 }
 0x2bf   :  { %511 = vmatpush.bf16.msrb.mxu1 %v1656_v11  ;;  %1733 = vmatpush.bf16.msrb.mxu3 %v1656_v11 }
 0x2c1   :  { %v355_v6 = vpop.xlane.xlu2 %354  ;;  %v358_v24 = vpop.xlane.xlu0 %357 }
 0x2c2   :  { %v381_v7 = vpop.xlane.xlu1 %380  ;;  %v401_v20 = vsel %vm398_vm13, %v355_v6, %v368_v4 }
 0x2c3   :  { %v406_v21 = vsel %vm403_vm14, %v401_v20, %v381_v7  ;;  %512 = vmatpush.bf16.msrb.mxu1 %v1655_v12  ;;  %1734 = vmatpush.bf16.msrb.mxu3 %v1655_v12 }
 0x2c7   :  { %513 = vmatpush.bf16.msrb.mxu1 %v1654_v0  ;;  %1735 = vmatpush.bf16.msrb.mxu3 %v1654_v0 }
 0x2c9   :  { %v394_v25 = vpop.xlane.xlu2 %393  ;;  %v397_v60 = vpop.xlane.xlu0 %396 }
 0x2ca   :  { %v411_v37 = vsel %vm408_vm15, %v406_v21, %v394_v25  ;;  %v371_v59 = vpop.xlane.xlu1 %370 }
 0x2cb   :  { %1542 = vmatmul.msk.f32.gmra.mxu2 %vm216_vm3, %v411_v37  ;;  %v402_v54 = vsel %vm398_vm13, %v358_v24, %v371_v59  ;;  %514 = vmatpush.bf16.msrb.mxu1 %v1653_v1 }
 0x2cc   :  { %1736 = vmatpush.bf16.msrb.mxu3 %v1653_v1 }
 0x2cf   :  { %515 = vmatpush.bf16.msrb.mxu1 %v1652_v19 }
 0x2d0   :  { %1737 = vmatpush.bf16.msrb.mxu3 %v1652_v19 }
 0x2d1   :  { %v384_v55 = vpop.xlane.xlu2 %383 }
 0x2d2   :  { %v407_v62 = vsel %vm403_vm14, %v402_v54, %v384_v55 }
 0x2d3   :  { %v412_v13 = vsel %vm408_vm15, %v407_v62, %v397_v60 }
 0x2d4   :  { %1543 = vmatmul.msk.f32.gmra.mxu2 %vm216_vm3, %v412_v13 }
 0x336   :  { %v434_v2 = vpop.f32.mrf.mxu2 }
 0x337   :  { %v446_v3 = vsub.f32 %v2045_v30, %v434_v2  ;;  %v531_v2 = vld [vmem:[#allocation2 + $0x58] sm:$0x3] }
 0x339   :  { %v450_v4 = vmul.f32 1.442695, %v446_v3  ;;  %v2136_v3 = vsel %vm229_vm1, %v531_v2, 0 }
 0x33a   :  { %554 = vmatpush.bf16.msra.mxu3 %v2136_v3 }
 0x33b   :  { %1756 = vpow2.f32 %v450_v4 }
 0x340   :  { %v437_v6 = vpop.f32.mrf.mxu2 }
 0x341   :  { %v447_v7 = vsub.f32 %v2059_v9, %v437_v6  ;;  %v1757_v24 = vpop.eup %1756 }
 0x343   :  { %v452_v20 = vmul.f32 1.442695, %v447_v7 }
 0x345   :  { %1758 = vpow2.f32 %v452_v20 }
 0x34b   :  { %v1759_v25 = vpop.eup %1758 }
 0x34c   :  { %v458_v21 = vpack.c.bf16 %v1759_v25, %v1757_v24 }
 0x34e   :  { %v440_v37 = vpop.f32.mrf.mxu2  ;;  %516 = vmatmul.bf16.vlgmr.msrb.gmra.mxu1 %v458_v21  ;;  %632 = vmatmul.bf16.vlgmr.msra.gmra.mxu0 %v458_v21 }
 0x34f   :  { %v448_v59 = vsub.f32 %v2072_v61, %v440_v37 }
 0x351   :  { %v454_v54 = vmul.f32 1.442695, %v448_v59 }
 0x353   :  { %1760 = vpow2.f32 %v454_v54 }
 0x357   :  { %v443_v55 = vpop.f32.mrf.mxu2 }
 0x358   :  { %v449_v60 = vsub.f32 %v2083_v8, %v443_v55 }
 0x359   :  { %v1761_v62 = vpop.eup %1760 }
 0x35a   :  { %v456_v30 = vmul.f32 1.442695, %v449_v60 }
 0x35c   :  { %1762 = vpow2.f32 %v456_v30  ;;  %v651_v30 = vpop.permute.xlu2 %650 }
 0x362   :  { %v1763_v9 = vpop.eup %1762 }
 0x363   :  { %v459_v13 = vpack.c.bf16 %v1763_v9, %v1761_v62 }
 0x365   :  { %521 = vmatmul.bf16.vlgmr.msrb.gmra.mxu3 %v459_v13  ;;  %637 = vmatmul.bf16.gmra.mxu0 %v459_v13 }
 0x366   :  { %794 = vmatpush.bf16.msrb.mxu3 %v1883_v10 }
 0x3cb   :  { %v517_v61 = vpop.f32.mrf.mxu1 }
 0x3cc   :  { %1764 = vrcp.f32 %v517_v61 }
 0x3d2   :  { %v1765_v4 = vpop.eup %1764 }
 0x3d3   :  { %v519_v8 = vpop.f32.mrf.mxu1  ;;  %1576 = vmatmul.msk.f32.vlgmr.msra.gmra.mxu3 %vm216_vm3, %v1765_v4 }
 0x3d4   :  { %1766 = vrcp.f32 %v519_v8  ;;  %1001 = vmatpush.bf16.msra.mxu3 %v2118_v42  ;;  %v1664_v42 = vld [vmem:[#allocation2 + $0xe0] sm:$0xff] }
 0x3d5   :  { %713 = vmatpush.bf16.msra.mxu2 %v1664_v42 }
 0x3d8   :  { %1002 = vmatpush.bf16.msra.mxu3 %v2122_v48  ;;  %v1663_v48 = vld [vmem:[#allocation2 + $0xd8] sm:$0xff] }
 0x3d9   :  { %714 = vmatpush.bf16.msra.mxu2 %v1663_v48 }
 0x3da   :  { %v1767_v6 = vpop.eup %1766 }
 0x3db   :  { %1577 = vmatmul.msk.f32.gmra.mxu3 %vm216_vm3, %v1767_v6 }
 0x3dc   :  { %1003 = vmatpush.bf16.msra.mxu3 %v1657_v63  ;;  %v633_v63 = vpop.f32.mrf.mxu0 }
 0x3dd   :  { %864 = vmatpush.bf16.msrb.mxu2 %v1883_v10 }
 0x3e0   :  { %1004 = vmatpush.bf16.msra.mxu3 %v1656_v11 }
 0x3e4   :  { %1005 = vmatpush.bf16.msra.mxu3 %v1655_v12  ;;  %v643_v12 = vld [vmem:[%s2382_s3] sm:$0x7]  ;;  %v635_v54 = vpop.f32.mrf.mxu0 }
 0x3e5   :  { %v664_v37 = vperm.slane %v643_v12, 0  ;;  %v669_v59 = vperm.slane %v643_v12, 1  ;;  %v674_v9 = vperm.slane %v643_v12, 2 }
 0x3e8   :  { %v522_v7 = vpop.f32.mrf.mxu3  ;;  %1006 = vmatpush.bf16.msra.mxu3 %v1654_v0 }
 0x3e9   :  { %1768 = vrcp.f32 %v522_v7 }
 0x3ec   :  { %1007 = vmatpush.bf16.msra.mxu3 %v1653_v1  ;;  %v649_v1 = vpop.permute.xlu1 %648  ;;  %v638_v42 = vpop.f32.mrf.mxu0 }
 0x3ef   :  { %v1769_v20 = vpop.eup %1768 }
 0x3f0   :  { %v524_v24 = vpop.f32.mrf.mxu3  ;;  %1578 = vmatmul.msk.f32.gmra.mxu3 %vm216_vm3, %v1769_v20  ;;  %v1666_v20 = vld [vmem:[#allocation2 + $0xf0] sm:$0xff] }
 0x3f1   :  { %1770 = vrcp.f32 %v524_v24  ;;  %1008 = vmatpush.bf16.msra.mxu3 %v1652_v19  ;;  %760 = vmatpush.bf16.msra.mxu1 %v1666_v20 }
 0x3f7   :  { %v1771_v25 = vpop.eup %1770 }
 0x3f8   :  { %1579 = vmatmul.msk.f32.gmra.mxu3 %vm216_vm3, %v1771_v25  ;;  %v1665_v25 = vld [vmem:[#allocation2 + $0xe8] sm:$0xff] }
 0x3f9   :  { %761 = vmatpush.bf16.msra.mxu1 %v1665_v25 }
 0x3fd   :  { %973 = vmatpush.bf16.msrb.mxu1 %v1883_v10 }
 0x456   :  { %v556_v11 = vpop.f32.mrf.mxu3 }
 0x457   :  { %v644_v0 = vmul.f32 %v633_v63, %v556_v11  ;;  %v653_v11 = vpop.permute.xlu0 %652 }
 0x459   :  { %v660_v21 = vadd.f32 %v649_v1, %v644_v0  ;;  %v640_v1 = vpop.f32.mrf.mxu0 }
 0x45b   :  { %v665_v19 = vadd.f32 %v664_v37, %v660_v21 }
 0x45d   :  { %v670_v62 = vmul.f32 %v669_v59, %v665_v19 }
 0x45e   :  { %v559_v55 = vpop.f32.mrf.mxu3 }
 0x45f   :  { %v645_v60 = vmul.f32 %v635_v54, %v559_v55  ;;  %v2150_v61 = vadd.f32 %v674_v9, %v670_v62  ;;  %v655_v54 = vpop.permute.xlu1 %654 }
 0x461   :  { %v661_v13 = vadd.f32 %v651_v30, %v645_v60  ;;  %v679_v6 = vmax.f32 %v2150_v61, 0.0 }
 0x463   :  { %v666_v2 = vadd.f32 %v664_v37, %v661_v13 }
 0x465   :  { %v671_v4 = vmul.f32 %v669_v59, %v666_v2 }
 0x467   :  { %v2152_v8 = vadd.f32 %v674_v9, %v671_v4 }
 0x469   :  { %v680_v7 = vmax.f32 %v2152_v8, 0.0 }
 0x46b   :  { %v687_v24 = vpack.c.bf16 %v680_v7, %v679_v6 }
 0x46d   :  { %1588 = vmatmul.msk.bf16.vlgmr.msra.gmra.mxu2 %vm83_vm2, %v687_v24 }
 0x473   :  { %v562_v48 = vpop.f32.mrf.mxu3 }
 0x474   :  { %v646_v63 = vmul.f32 %v638_v42, %v562_v48 }
 0x476   :  { %v662_v12 = vadd.f32 %v653_v11, %v646_v63 }
 0x478   :  { %v667_v0 = vadd.f32 %v664_v37, %v662_v12 }
 0x47a   :  { %v672_v55 = vmul.f32 %v669_v59, %v667_v0 }
 0x47b   :  { %v565_v21 = vpop.f32.mrf.mxu3 }
 0x47c   :  { %v647_v19 = vmul.f32 %v640_v1, %v565_v21  ;;  %v2162_v13 = vadd.f32 %v674_v9, %v672_v55 }
 0x47e   :  { %v663_v60 = vadd.f32 %v655_v54, %v647_v19  ;;  %v681_v4 = vmax.f32 %v2162_v13, 0.0 }
 0x480   :  { %v668_v30 = vadd.f32 %v664_v37, %v663_v60 }
 0x482   :  { %v673_v62 = vmul.f32 %v669_v59, %v668_v30 }
 0x484   :  { %v2164_v2 = vadd.f32 %v674_v9, %v673_v62 }
 0x486   :  { %v682_v10 = vmax.f32 %v2164_v2, 0.0 }
 0x488   :  { %v688_v20 = vpack.c.bf16 %v682_v10, %v681_v4 }
 0x48a   :  { %1589 = vmatmul.msk.bf16.gmra.mxu2 %vm83_vm2, %v688_v20 }
 0x4f0   :  { %v716_v24 = vpop.f32.mrf.mxu2 }
 0x4f1   :  { %1598 = vmatmul.msk.f32.vlgmr.msra.gmra.mxu1 %vm83_vm2, %v716_v24  ;;  %v1069_v11 = vmul.f32 %v1705_v22, %v716_v24 }
 0x4f8   :  { %v718_v37 = vpop.f32.mrf.mxu2 }
 0x4f9   :  { %1599 = vmatmul.msk.f32.gmra.mxu1 %vm83_vm2, %v718_v37  ;;  %v1070_v63 = vmul.f32 %v1706_v18, %v718_v37  ;;  %v1065_v18 = vmul.f32 %v1697_v34, %v716_v24  ;;  %v1062_v23 = vmul.f32 %v1690_v44, %v718_v37  ;;  %v1058_v35 = vmul.f32 %v1682_v56, %v718_v37 }
 0x4fb   :  { %v1079_v12 = vpack.c.bf16 %v1070_v63, %v1069_v11 }
 0x50d   :  { %v721_v59 = vpop.f32.mrf.mxu2 }
 0x50e   :  { %1600 = vmatmul.msk.f32.gmra.mxu1 %vm83_vm2, %v721_v59  ;;  %v1071_v25 = vmul.f32 %v1709_v15, %v721_v59  ;;  %v1067_v15 = vmul.f32 %v1701_v28, %v721_v59  ;;  %v1063_v22 = vmul.f32 %v1693_v40, %v721_v59  ;;  %v1061_v28 = vmul.f32 %v1689_v46, %v716_v24 }
 0x50f   :  { %v1059_v34 = vmul.f32 %v1685_v52, %v721_v59  ;;  %v1057_v40 = vmul.f32 %v1681_v58, %v716_v24 }
 0x511   :  { %v1073_v44 = vpack.c.bf16 %v1058_v35, %v1057_v40 }
 0x515   :  { %v723_v9 = vpop.f32.mrf.mxu2 }
 0x516   :  { %v1072_v42 = vmul.f32 %v1710_v16, %v723_v9  ;;  %1601 = vmatmul.msk.f32.gmra.mxu1 %vm83_vm2, %v723_v9  ;;  %v1068_v0 = vmul.f32 %v1702_v26, %v723_v9  ;;  %v1066_v16 = vmul.f32 %v1698_v32, %v718_v37  ;;  %v1064_v17 = vmul.f32 %v1694_v38, %v723_v9 }
 0x517   :  { %v1075_v32 = vpack.c.bf16 %v1062_v23, %v1061_v28  ;;  %v1060_v29 = vmul.f32 %v1686_v50, %v723_v9 }
 0x518   :  { %v1080_v48 = vpack.c.bf16 %v1072_v42, %v1071_v25  ;;  %v1078_v14 = vpack.c.bf16 %v1068_v0, %v1067_v15  ;;  %v1077_v1 = vpack.c.bf16 %v1066_v16, %v1065_v18  ;;  %v1076_v26 = vpack.c.bf16 %v1064_v17, %v1063_v22 }
 0x519   :  { %v1074_v38 = vpack.c.bf16 %v1060_v29, %v1059_v34 }
 0x51a   :  { %1081 = vmatpush.bf16.msra.mxu2 %v1080_v48 }
 0x51e   :  { %1082 = vmatpush.bf16.msra.mxu2 %v1079_v12 }
 0x522   :  { %1083 = vmatpush.bf16.msra.mxu2 %v1078_v14 }
 0x526   :  { %1084 = vmatpush.bf16.msra.mxu2 %v1077_v1 }
 0x52a   :  { %1085 = vmatpush.bf16.msra.mxu2 %v1076_v26 }
 0x52e   :  { %1086 = vmatpush.bf16.msra.mxu2 %v1075_v32 }
 0x532   :  { %1087 = vmatpush.bf16.msra.mxu2 %v1074_v38 }
 0x536   :  { %1088 = vmatpush.bf16.msra.mxu2 %v1073_v44 }
 0x56e   :  { %v763_v41 = vpop.f32.mrf.mxu1 }
 0x56f   :  { %841 = vrot.lane.b32.xlu0 %v763_v41, %s1833_s0  ;;  %1602 = vmatmul.msk.f32.vlgmr.msrb.gmra.mxu3 %vm216_vm3, %v763_v41 }
 0x576   :  { %v766_v46 = vpop.f32.mrf.mxu1 }
 0x577   :  { %843 = vrot.lane.b32.xlu2 %v766_v46, %s1833_s0  ;;  %1603 = vmatmul.msk.f32.gmra.mxu3 %vm216_vm3, %v766_v46 }
 0x58b   :  { %v769_v47 = vpop.f32.mrf.mxu1 }
 0x58c   :  { %845 = vrot.lane.b32.xlu1 %v769_v47, %s1833_s0  ;;  %1604 = vmatmul.msk.f32.gmra.mxu3 %vm216_vm3, %v769_v47 }
 0x593   :  { %v772_v50 = vpop.f32.mrf.mxu1 }
 0x594   :  { %847 = vrot.lane.b32.xlu0 %v772_v50, %s1833_s0  ;;  %1605 = vmatmul.msk.f32.gmra.mxu3 %vm216_vm3, %v772_v50 }
 0x5d1   :  { %v844_v53 = vpop.permute.xlu2 %843 }
 0x5e1   :  { %v842_v52 = vpop.permute.xlu0 %841 }
 0x5e2   :  { %1610 = vmatmul.msk.f32.vlgmr.msrb.gmra.mxu2 %vm216_vm3, %v842_v52 }
 0x5ea   :  { %1611 = vmatmul.msk.f32.gmra.mxu2 %vm216_vm3, %v844_v53 }
 0x5f2   :  { %v796_v56 = vpop.f32.mrf.mxu3 }
 0x5f3   :  { %v808_v20 = vmul.f32 %v1673_v45, %v796_v56 }
 0x5fa   :  { %v799_v19 = vpop.f32.mrf.mxu3 }
 0x5fb   :  { %v809_v62 = vmul.f32 %v1674_v39, %v799_v19 }
 0x5fe   :  { %v846_v58 = vpop.permute.xlu1 %845 }
 0x5ff   :  { %1612 = vmatmul.msk.f32.gmra.mxu2 %vm216_vm3, %v846_v58 }
 0x606   :  { %v848_v21 = vpop.permute.xlu0 %847 }
 0x607   :  { %1613 = vmatmul.msk.f32.gmra.mxu2 %vm216_vm3, %v848_v21 }
 0x60f   :  { %v802_v54 = vpop.f32.mrf.mxu3 }
 0x610   :  { %v810_v30 = vmul.f32 %v1677_v33, %v802_v54 }
 0x617   :  { %v805_v55 = vpop.f32.mrf.mxu3 }
 0x618   :  { %v811_v60 = vmul.f32 %v1678_v31, %v805_v55 }
 0x61a   :  { %824 = vmatpush.msrb.mxu0 %v811_v60 }
 0x61c   :  { %825 = vmatpush.msrb.mxu0 %v810_v30 }
 0x61e   :  { %826 = vmatpush.msrb.mxu0 %v809_v62 }
 0x620   :  { %827 = vmatpush.msrb.mxu0 %v808_v20 }
 0x621   :  { %1606 = vmatmul.msk.f32.vlgmr.msrb.gmra.mxu0 %vm83_vm2, %v1836_v57 }
 0x622   :  { %1043 = vmatpush.bf16.msra.mxu0 %v2136_v3 }
 0x629   :  { %1607 = vmatmul.msk.f32.gmra.mxu0 %vm83_vm2, %v1836_v57 }
 0x631   :  { %1608 = vmatmul.msk.f32.gmra.mxu0 %vm83_vm2, %v1836_v57 }
 0x639   :  { %1609 = vmatmul.msk.f32.gmra.mxu0 %vm83_vm2, %v1836_v57 }
 0x665   :  { %v866_v27 = vpop.f32.mrf.mxu2 }
 0x66d   :  { %v869_v45 = vpop.f32.mrf.mxu2 }
 0x682   :  { %v872_v63 = vpop.f32.mrf.mxu2 }
 0x68a   :  { %v875_v22 = vpop.f32.mrf.mxu2 }
 0x69e   :  { %v829_v31 = vpop.f32.mrf.mxu0 }
 0x69f   :  { %v867_v33 = vadd.f32 %v866_v27, %v829_v31 }
 0x6a1   :  { %vm878_vm0 = vcmp.ge.f32.partialorder %v867_v33, 0.0  ;;  %v882_v36 = vmul.f32 0.2, %v867_v33 }
 0x6a3   :  { %v886_v39 = vsel %vm878_vm0, %v867_v33, %v882_v36 }
 0x6a4   :  { %v2239_v24 = vadd.f32 %v886_v39, %v2041_v43 }
 0x6a6   :  { %v832_v3 = vpop.f32.mrf.mxu0  ;;  %v918_v37 = vsel %vm372_vm7, %v2239_v24, -inf  ;;  %v906_v59 = vsel %vm359_vm8, %v2239_v24, -inf  ;;  %v894_v9 = vsel %vm83_vm2, %v2239_v24, -inf  ;;  %v930_v16 = vsel %vm385_vm10, %v2239_v24, -inf }
 0x6a7   :  { %v870_v25 = vadd.f32 %v869_v45, %v832_v3  ;;  %919 = vmax.xlane.f32.xlu0 %v918_v37  ;;  %907 = vmax.xlane.f32.xlu1 %v906_v59 }
 0x6a8   :  { %895 = vmax.xlane.f32.xlu2 %v894_v9 }
 0x6a9   :  { %vm879_vm1 = vcmp.ge.f32.partialorder %v870_v25, 0.0  ;;  %v883_v42 = vmul.f32 0.2, %v870_v25 }
 0x6ab   :  { %v887_v48 = vsel %vm879_vm1, %v870_v25, %v883_v42 }
 0x6ac   :  { %v2248_v11 = vadd.f32 %v887_v48, %v2054_v49 }
 0x6ae   :  { %v835_v12 = vpop.f32.mrf.mxu0  ;;  %v909_v0 = vsel %vm359_vm8, %v2248_v11, -inf  ;;  %v897_v15 = vsel %vm83_vm2, %v2248_v11, -inf  ;;  %v933_v23 = vsel %vm385_vm10, %v2248_v11, -inf  ;;  %v921_v29 = vsel %vm372_vm7, %v2248_v11, -inf }
 0x6af   :  { %v873_v14 = vadd.f32 %v872_v63, %v835_v12  ;;  %910 = vmax.xlane.f32.xlu0 %v909_v0  ;;  %898 = vmax.xlane.f32.xlu1 %v897_v15 }
 0x6b0   :  { %931 = vmax.xlane.f32.xlu2 %v930_v16 }
 0x6b1   :  { %vm880_vm4 = vcmp.ge.f32.partialorder %v873_v14, 0.0  ;;  %v884_v18 = vmul.f32 0.2, %v873_v14 }
 0x6b3   :  { %v888_v1 = vsel %vm880_vm4, %v873_v14, %v884_v18 }
 0x6b4   :  { %v2257_v17 = vadd.f32 %v888_v1, %v2068_v51 }
 0x6b6   :  { %v838_v26 = vpop.f32.mrf.mxu0  ;;  %v900_v28 = vsel %vm83_vm2, %v2257_v17, -inf  ;;  %v924_v38 = vsel %vm372_vm7, %v2257_v17, -inf  ;;  %v936_v35 = vsel %vm385_vm10, %v2257_v17, -inf  ;;  %v912_v44 = vsel %vm359_vm8, %v2257_v17, -inf }
 0x6b7   :  { %v876_v32 = vadd.f32 %v875_v22, %v838_v26  ;;  %934 = vmax.xlane.f32.xlu1 %v933_v23  ;;  %901 = vmax.xlane.f32.xlu0 %v900_v28 }
 0x6b8   :  { %922 = vmax.xlane.f32.xlu2 %v921_v29 }
 0x6b9   :  { %v885_v34 = vmul.f32 0.2, %v876_v32  ;;  %vm881_vm5 = vcmp.ge.f32.partialorder %v876_v32, 0.0 }
 0x6bb   :  { %v889_v40 = vsel %vm881_vm5, %v876_v32, %v885_v34 }
 0x6bc   :  { %v893_v41 = vadd.f32 %v889_v40, %v2080_v5 }
 0x6be   :  { %v927_v46 = vsel %vm372_vm7, %v893_v41, -inf  ;;  %v915_v47 = vsel %vm359_vm8, %v893_v41, -inf  ;;  %v903_v50 = vsel %vm83_vm2, %v893_v41, -inf  ;;  %v939_v52 = vsel %vm385_vm10, %v893_v41, -inf }
 0x6bf   :  { %925 = vmax.xlane.f32.xlu1 %v924_v38  ;;  %937 = vmax.xlane.f32.xlu0 %v936_v35 }
 0x6c0   :  { %913 = vmax.xlane.f32.xlu2 %v912_v44 }
 0x6c7   :  { %928 = vmax.xlane.f32.xlu0 %v927_v46  ;;  %916 = vmax.xlane.f32.xlu1 %v915_v47 }
 0x6c8   :  { %904 = vmax.xlane.f32.xlu2 %v903_v50 }
 0x6d0   :  { %940 = vmax.xlane.f32.xlu2 %v939_v52 }
 0x71a   :  { %v920_v53 = vpop.xlane.xlu0 %919  ;;  %v908_v56 = vpop.xlane.xlu1 %907 }
 0x71b   :  { %v896_v58 = vpop.xlane.xlu2 %895 }
 0x71c   :  { %v942_v21 = vsel %vm398_vm13, %v896_v58, %v908_v56 }
 0x71d   :  { %v946_v55 = vsel %vm403_vm14, %v942_v21, %v920_v53  ;;  %v1670_v21 = vld [vmem:[#allocation2 + $0x100] sm:$0xff] }
 0x71e   :  { %1166 = vmatpush.bf16.msra.mxu1 %v1670_v21 }
 0x722   :  { %v911_v19 = vpop.xlane.xlu0 %910  ;;  %v899_v54 = vpop.xlane.xlu1 %898 }
 0x723   :  { %v932_v60 = vpop.xlane.xlu2 %931  ;;  %v943_v20 = vsel %vm398_vm13, %v899_v54, %v911_v19  ;;  %v1669_v19 = vld [vmem:[#allocation2 + $0xf8] sm:$0xff] }
 0x724   :  { %v950_v30 = vsel %vm408_vm15, %v946_v55, %v932_v60  ;;  %1167 = vmatpush.bf16.msra.mxu1 %v1669_v19  ;;  %v1100_v60 = vld [vmem:[%s2382_s3 + $0x8] sm:$0x7] }
 0x725   :  { %1614 = vmatmul.msk.f32.vlgmr.msrb.gmra.mxu1 %vm216_vm3, %v950_v30 }
 0x72a   :  { %v935_v62 = vpop.xlane.xlu1 %934  ;;  %v902_v31 = vpop.xlane.xlu0 %901 }
 0x72b   :  { %v923_v27 = vpop.xlane.xlu2 %922 }
 0x72c   :  { %v947_v33 = vsel %vm403_vm14, %v943_v20, %v923_v27  ;;  %v1109_v20 = vperm.slane %v1100_v60, 0 }
 0x72d   :  { %v951_v36 = vsel %vm408_vm15, %v947_v33, %v935_v62 }
 0x72e   :  { %1615 = vmatmul.msk.f32.gmra.mxu1 %vm216_vm3, %v951_v36 }
 0x732   :  { %v926_v39 = vpop.xlane.xlu1 %925  ;;  %v938_v37 = vpop.xlane.xlu0 %937 }
 0x733   :  { %v914_v45 = vpop.xlane.xlu2 %913 }
 0x734   :  { %v944_v3 = vsel %vm398_vm13, %v902_v31, %v914_v45  ;;  %v1114_v31 = vperm.slane %v1100_v60, 1 }
 0x735   :  { %v948_v59 = vsel %vm403_vm14, %v944_v3, %v926_v39  ;;  %v1119_v3 = vperm.slane %v1100_v60, 2 }
 0x736   :  { %v952_v9 = vsel %vm408_vm15, %v948_v59, %v938_v37 }
 0x737   :  { %1616 = vmatmul.msk.f32.gmra.mxu1 %vm216_vm3, %v952_v9  ;;  %v1179_v9 = vld [vmem:[#allocation2 + $0x108] sm:$0xf] }
 0x73a   :  { %v917_v42 = vpop.xlane.xlu1 %916  ;;  %v929_v48 = vpop.xlane.xlu0 %928 }
 0x73b   :  { %v905_v25 = vpop.xlane.xlu2 %904 }
 0x73c   :  { %v945_v63 = vsel %vm398_vm13, %v905_v25, %v917_v42 }
 0x73d   :  { %v949_v0 = vsel %vm403_vm14, %v945_v63, %v929_v48 }
 0x743   :  { %v941_v12 = vpop.xlane.xlu2 %940 }
 0x744   :  { %v953_v15 = vsel %vm408_vm15, %v949_v0, %v941_v12 }
 0x745   :  { %1617 = vmatmul.msk.f32.gmra.mxu1 %vm216_vm3, %v953_v15 }
 0x7a2   :  { %v975_v14 = vpop.f32.mrf.mxu1 }
 0x7a3   :  { %v987_v16 = vsub.f32 %v2239_v24, %v975_v14 }
 0x7a5   :  { %v991_v18 = vmul.f32 1.442695, %v987_v16 }
 0x7a7   :  { %1772 = vpow2.f32 %v991_v18 }
 0x7ab   :  { %v978_v1 = vpop.f32.mrf.mxu1 }
 0x7ac   :  { %v988_v22 = vsub.f32 %v2248_v11, %v978_v1 }
 0x7ad   :  { %v1773_v23 = vpop.eup %1772 }
 0x7ae   :  { %v993_v26 = vmul.f32 1.442695, %v988_v22 }
 0x7b0   :  { %1774 = vpow2.f32 %v993_v26 }
 0x7b4   :  { %v981_v29 = vpop.f32.mrf.mxu1 }
 0x7b5   :  { %v989_v34 = vsub.f32 %v2257_v17, %v981_v29 }
 0x7b6   :  { %v1775_v28 = vpop.eup %1774 }
 0x7b7   :  { %v999_v32 = vpack.c.bf16 %v1775_v28, %v1773_v23  ;;  %v995_v38 = vmul.f32 1.442695, %v989_v34 }
 0x7b9   :  { %1009 = vmatmul.bf16.vlgmr.msra.gmra.mxu3 %v999_v32  ;;  %1089 = vmatmul.bf16.vlgmr.msra.gmra.mxu2 %v999_v32  ;;  %1776 = vpow2.f32 %v995_v38 }
 0x7bf   :  { %v1777_v24 = vpop.eup %1776 }
 0x7c2   :  { %v984_v35 = vpop.f32.mrf.mxu1 }
 0x7c3   :  { %v990_v40 = vsub.f32 %v893_v41, %v984_v35 }
 0x7c5   :  { %v997_v44 = vmul.f32 1.442695, %v990_v40 }
 0x7c7   :  { %1778 = vpow2.f32 %v997_v44 }
 0x7cd   :  { %v1779_v46 = vpop.eup %1778 }
 0x7ce   :  { %v1000_v11 = vpack.c.bf16 %v1779_v46, %v1777_v24  ;;  %v1837_v24 = vmov 0  }
 0x7cf   :  { %1749 = vset.pattern.permute.xlu2 %v1837_v24  ;;  %1748 = vset.pattern.permute.xlu0 %v1837_v24 }
 0x7d0   :  { %1014 = vmatmul.bf16.gmra.mxu3 %v1000_v11  ;;  %1094 = vmatmul.bf16.gmra.mxu2 %v1000_v11 }
 0x7d1   :  { %1750 = vset.pattern.permute.xlu1 %v1837_v24 }
 0x83c   :  { %v1010_v47 = vpop.f32.mrf.mxu3  ;;  %v1090_v54 = vpop.f32.mrf.mxu2 }
 0x83d   :  { %1780 = vrcp.f32 %v1010_v47  ;;  %v1838_v47 = vmov 1  }
 0x843   :  { %v1781_v50 = vpop.eup %1780 }
 0x844   :  { %v1012_v52 = vpop.f32.mrf.mxu3  ;;  %1618 = vmatmul.msk.f32.vlgmr.msra.gmra.mxu0 %vm216_vm3, %v1781_v50  ;;  %v1092_v33 = vpop.f32.mrf.mxu2 }
 0x845   :  { %1782 = vrcp.f32 %v1012_v52 }
 0x84b   :  { %v1783_v53 = vpop.eup %1782 }
 0x84c   :  { %1619 = vmatmul.msk.f32.gmra.mxu0 %vm216_vm3, %v1783_v53  ;;  %v1729_v53 = vld [vmem:[#allocation2 + $0xa8] sm:$0xff]  }
 0x853   :  { %v1015_v17 = vpop.f32.mrf.mxu3  ;;  %v1095_v12 = vpop.f32.mrf.mxu2 }
 0x854   :  { %1784 = vrcp.f32 %v1015_v17  ;;  %v1718_v17 = vunpack.c.h.bf16 %v1729_v53 }
 0x85a   :  { %v1785_v41 = vpop.eup %1784 }
 0x85b   :  { %v1017_v56 = vpop.f32.mrf.mxu3  ;;  %1620 = vmatmul.msk.f32.gmra.mxu0 %vm216_vm3, %v1785_v41  ;;  %v1097_v16 = vpop.f32.mrf.mxu2  ;;  %v1728_v41 = vld [vmem:[#allocation2 + $0xa0] sm:$0xff]  }
 0x85c   :  { %1786 = vrcp.f32 %v1017_v56  ;;  %v1717_v56 = vunpack.c.l.bf16 %v1729_v53  ;;  %v1714_v19 = vunpack.c.h.bf16 %v1728_v41 }
 0x862   :  { %v1787_v58 = vpop.eup %1786 }
 0x863   :  { %1621 = vmatmul.msk.f32.gmra.mxu0 %vm216_vm3, %v1787_v58  ;;  %vm1193_vm3 = vcmask 1043456  }
 0x864   :  { %v1195_v48 = vsel %vm1193_vm3, %v1179_v9, 0 }
 0x865   :  { %1204 = vmatpush.bf16.msrb.mxu3 %v1195_v48 }
 0x8c1   :  { %v1045_v55 = vpop.f32.mrf.mxu0 }
 0x8c2   :  { %v1101_v30 = vmul.f32 %v1090_v54, %v1045_v55 }
 0x8c4   :  { %v1105_v62 = vadd.f32 %v1101_v30, %v679_v6 }
 0x8c6   :  { %v1110_v27 = vadd.f32 %v1109_v20, %v1105_v62  ;;  %v1713_v62 = vunpack.c.l.bf16 %v1728_v41 }
 0x8c8   :  { %v1115_v45 = vmul.f32 %v1114_v31, %v1110_v27 }
 0x8c9   :  { %v1048_v36 = vpop.f32.mrf.mxu0 }
 0x8ca   :  { %v1102_v39 = vmul.f32 %v1092_v33, %v1048_v36  ;;  %v1120_v25 = vadd.f32 %v1119_v3, %v1115_v45 }
 0x8cc   :  { %v1106_v37 = vadd.f32 %v1102_v39, %v680_v7  ;;  %v1124_v6 = vmax.f32 %v1120_v25, 0.0 }
 0x8ce   :  { %v1111_v59 = vadd.f32 %v1109_v20, %v1106_v37 }
 0x8d0   :  { %v1116_v42 = vmul.f32 %v1114_v31, %v1111_v59 }
 0x8d2   :  { %v1121_v61 = vadd.f32 %v1119_v3, %v1116_v42 }
 0x8d4   :  { %v1125_v63 = vmax.f32 %v1121_v61, 0.0 }
 0x8d6   :  { %v1140_v0 = vpack.c.bf16 %v1125_v63, %v1124_v6 }
 0x8d8   :  { %v1051_v15 = vpop.f32.mrf.mxu0  ;;  %1630 = vmatmul.msk.bf16.vlgmr.msra.gmra.mxu1 %vm83_vm2, %v1140_v0 }
 0x8d9   :  { %v1103_v14 = vmul.f32 %v1095_v12, %v1051_v15 }
 0x8db   :  { %v1107_v8 = vadd.f32 %v1103_v14, %v681_v4 }
 0x8dd   :  { %v1112_v7 = vadd.f32 %v1109_v20, %v1107_v8 }
 0x8df   :  { %v1117_v22 = vmul.f32 %v1114_v31, %v1112_v7 }
 0x8e0   :  { %v1054_v18 = vpop.f32.mrf.mxu0 }
 0x8e1   :  { %v1104_v1 = vmul.f32 %v1097_v16, %v1054_v18  ;;  %v1122_v32 = vadd.f32 %v1119_v3, %v1117_v22 }
 0x8e3   :  { %v1108_v26 = vadd.f32 %v1104_v1, %v682_v10  ;;  %v1126_v34 = vmax.f32 %v1122_v32, 0.0 }
 0x8e5   :  { %v1113_v23 = vadd.f32 %v1109_v20, %v1108_v26  ;;  %v1668_v26 = vld [vmem:[#allocation2 + $0xb8] sm:$0xff] }
 0x8e6   :  { %1361 = vmatpush.bf16.msrb.mxu2 %v1668_v26 }
 0x8e7   :  { %v1118_v28 = vmul.f32 %v1114_v31, %v1113_v23 }
 0x8e9   :  { %v1123_v29 = vadd.f32 %v1119_v3, %v1118_v28 }
 0x8eb   :  { %v1127_v38 = vmax.f32 %v1123_v29, 0.0 }
 0x8ed   :  { %v1141_v35 = vpack.c.bf16 %v1127_v38, %v1126_v34 }
 0x8ef   :  { %1631 = vmatmul.msk.bf16.gmra.mxu1 %vm83_vm2, %v1141_v35 }
 0x955   :  { %v2312_v13 = vpop.f32.mrf.mxu1 }
 0x956   :  { %1632 = vmatmul.msk.f32.vlgmr.msrb.gmra.mxu3 %vm1180_vm6, %v2312_v13 }
 0x95d   :  { %v2316_v4 = vpop.f32.mrf.mxu1 }
 0x95e   :  { %1633 = vmatmul.msk.f32.gmra.mxu3 %vm1180_vm6, %v2316_v4  ;;  %v1430_v44 = vpack.c.bf16 %v2316_v4, %v2312_v13 }
 0x96c   :  { %v2320_v2 = vpop.f32.mrf.mxu1 }
 0x96d   :  { %1634 = vmatmul.msk.f32.gmra.mxu3 %vm1180_vm6, %v2320_v2 }
 0x974   :  { %v2324_v10 = vpop.f32.mrf.mxu1 }
 0x975   :  { %v1431_v40 = vpack.c.bf16 %v2324_v10, %v2320_v2  ;;  %1635 = vmatmul.msk.f32.gmra.mxu3 %vm1180_vm6, %v2324_v10 }
 0x977   :  { %1438 = vmatpush.bf16.msrb.mxu1 %v1431_v40 }
 0x97b   :  { %1439 = vmatpush.bf16.msrb.mxu1 %v1430_v44 }
 0x9d9   :  { %v1206_v46 = vpop.f32.mrf.mxu3 }
 0x9e1   :  { %v1209_v11 = vpop.f32.mrf.mxu3 }
 0x9e2   :  { %1229 = vperm.xlu2 %1749, %v1209_v11  }
 0x9ea   :  { %1751 = vset.pattern.permute.xlu2 %v1838_v47 }
 0x9eb   :  { %1276 = vperm.xlu2 %1751, %v1206_v46  }
 0x9f0   :  { %v1212_v50 = vpop.f32.mrf.mxu3 }
 0x9f1   :  { %1234 = vperm.xlu0 %1748, %v1212_v50  }
 0x9f3   :  { %1284 = vperm.xlu2 %1751, %v1212_v50  }
 0x9f8   :  { %v1215_v52 = vpop.f32.mrf.mxu3 }
 0x9f9   :  { %1239 = vperm.xlu1 %1750, %v1215_v52  }
 0x9fb   :  { %1753 = vset.pattern.permute.xlu2 %v1837_v24 }
 0xa01   :  { %1224 = vperm.xlu1 %1750, %v1206_v46  }
 0xa09   :  { %1752 = vset.pattern.permute.xlu1 %v1838_v47 }
 0xa0a   :  { %1280 = vperm.xlu1 %1752, %v1209_v11  }
 0xa12   :  { %1288 = vperm.xlu1 %1752, %v1215_v52  }
 0xa1a   :  { %1754 = vset.pattern.permute.xlu1 %v1837_v24 }
 0xa3c   :  { %v1230_v55 = vpop.permute.xlu2 %1229 }
 0xa3d   :  { %v1243_v30 = vmul.f32 %v1714_v19, %v1230_v55 }
 0xa45   :  { %v1277_v31 = vpop.permute.xlu2 %1276 }
 0xa63   :  { %v1235_v58 = vpop.permute.xlu0 %1234 }
 0xa64   :  { %v1244_v60 = vmul.f32 %v1717_v56, %v1235_v58 }
 0xa6b   :  { %v1240_v21 = vpop.permute.xlu1 %1239 }
 0xa6c   :  { %v1245_v54 = vmul.f32 %v1718_v17, %v1240_v21 }
 0xa6e   :  { %1258 = vmatpush.msrb.mxu0 %v1245_v54 }
 0xa70   :  { %1259 = vmatpush.msrb.mxu0 %v1244_v60 }
 0xa72   :  { %1260 = vmatpush.msrb.mxu0 %v1243_v30 }
 0xa73   :  { %v1225_v20 = vpop.permute.xlu1 %1224 }
 0xa74   :  { %v1242_v27 = vmul.f32 %v1713_v62, %v1225_v20 }
 0xa76   :  { %1261 = vmatpush.msrb.mxu0 %v1242_v27 }
 0xa77   :  { %1636 = vmatmul.msk.f32.vlgmr.msrb.gmra.mxu0 %vm83_vm2, %v1836_v57 }
 0xa7c   :  { %v1281_v37 = vpop.permute.xlu1 %1280 }
 0xa7f   :  { %1637 = vmatmul.msk.f32.gmra.mxu0 %vm83_vm2, %v1836_v57 }
 0xa84   :  { %v1289_v14 = vpop.permute.xlu1 %1288 }
 0xa87   :  { %1638 = vmatmul.msk.f32.gmra.mxu0 %vm83_vm2, %v1836_v57 }
 0xa8f   :  { %1639 = vmatmul.msk.f32.gmra.mxu0 %vm83_vm2, %v1836_v57  ;;  %v1285_v57 = vpop.permute.xlu2 %1284 }
 0xaf4   :  { %v1263_v33 = vpop.f32.mrf.mxu0 }
 0xaf5   :  { %v1291_v36 = vadd.f32 %v1277_v31, %v1263_v33 }
 0xaf7   :  { %vm1295_vm7 = vcmp.ge.f32.partialorder %v1291_v36, 0.0  ;;  %v1299_v39 = vmul.f32 0.2, %v1291_v36 }
 0xaf9   :  { %v1303_v45 = vsel %vm1295_vm7, %v1291_v36, %v1299_v39 }
 0xafa   :  { %v1307_v3 = vadd.f32 %v1303_v45, %v2041_v43 }
 0xafc   :  { %v1266_v59 = vpop.f32.mrf.mxu0  ;;  %v1311_v9 = vsel %vm83_vm2, %v1307_v3, -inf }
 0xafd   :  { %v1292_v25 = vadd.f32 %v1281_v37, %v1266_v59  ;;  %1312 = vmax.xlane.f32.xlu0 %v1311_v9 }
 0xaff   :  { %vm1296_vm8 = vcmp.ge.f32.partialorder %v1292_v25, 0.0  ;;  %v1300_v42 = vmul.f32 0.2, %v1292_v25 }
 0xb01   :  { %v1304_v48 = vsel %vm1296_vm8, %v1292_v25, %v1300_v42 }
 0xb02   :  { %v1308_v61 = vadd.f32 %v1304_v48, %v2054_v49 }
 0xb04   :  { %v1269_v6 = vpop.f32.mrf.mxu0  ;;  %v1314_v63 = vsel %vm83_vm2, %v1308_v61, -inf }
 0xb05   :  { %v1293_v12 = vadd.f32 %v1285_v57, %v1269_v6  ;;  %1315 = vmax.xlane.f32.xlu2 %v1314_v63 }
 0xb07   :  { %vm1297_vm9 = vcmp.ge.f32.partialorder %v1293_v12, 0.0  ;;  %v1301_v0 = vmul.f32 0.2, %v1293_v12 }
 0xb09   :  { %v1305_v43 = vsel %vm1297_vm9, %v1293_v12, %v1301_v0 }
 0xb0a   :  { %v1309_v15 = vadd.f32 %v1305_v43, %v2068_v51  ;;  %v1667_v51 = vld [vmem:[#allocation2 + $0xb0] sm:$0xff] }
 0xb0b   :  { %1362 = vmatpush.bf16.msrb.mxu2 %v1667_v51 }
 0xb0c   :  { %v1272_v8 = vpop.f32.mrf.mxu0  ;;  %v1317_v7 = vsel %vm83_vm2, %v1309_v15, -inf }
 0xb0d   :  { %v1294_v16 = vadd.f32 %v1289_v14, %v1272_v8  ;;  %1318 = vmax.xlane.f32.xlu1 %v1317_v7 }
 0xb0f   :  { %vm1298_vm10 = vcmp.ge.f32.partialorder %v1294_v16, 0.0  ;;  %v1302_v18 = vmul.f32 0.2, %v1294_v16 }
 0xb11   :  { %v1306_v49 = vsel %vm1298_vm10, %v1294_v16, %v1302_v18 }
 0xb12   :  { %v1310_v1 = vadd.f32 %v1306_v49, %v2080_v5 }
 0xb14   :  { %v1320_v22 = vsel %vm83_vm2, %v1310_v1, -inf }
 0xb15   :  { %1321 = vmax.xlane.f32.xlu0 %v1320_v22 }
 0xb29   :  { %1476 = vrot.lane.b32.xlu0 %v2312_v13, %s1839_s10 }
 0xb70   :  { %v1313_v23 = vpop.xlane.xlu0 %1312 }
 0xb71   :  { %v1323_v28 = vsub.f32 %v1307_v3, %v1313_v23 }
 0xb73   :  { %v1327_v32 = vmul.f32 1.442695, %v1323_v28 }
 0xb75   :  { %1788 = vpow2.f32 %v1327_v32  ;;  %v1755_v32 = vld [vmem:[%s2382_s3 + $0x10] ss:$0 sm:$0xff] }
 0xb78   :  { %v1316_v29 = vpop.xlane.xlu2 %1315 }
 0xb79   :  { %v1324_v34 = vsub.f32 %v1308_v61, %v1316_v29 }
 0xb7b   :  { %v1329_v38 = vmul.f32 1.442695, %v1324_v34  ;;  %v1789_v35 = vpop.eup %1788 }
 0xb7d   :  { %1790 = vpow2.f32 %v1329_v38 }
 0xb80   :  { %v1319_v5 = vpop.xlane.xlu1 %1318 }
 0xb81   :  { %v1325_v24 = vsub.f32 %v1309_v15, %v1319_v5 }
 0xb83   :  { %v1791_v40 = vpop.eup %1790  ;;  %v1331_v13 = vmul.f32 1.442695, %v1325_v24 }
 0xb84   :  { %v1335_v44 = vpack.c.bf16 %v1791_v40, %v1789_v35 }
 0xb85   :  { %1792 = vpow2.f32 %v1331_v13 }
 0xb86   :  { %1648 = vmatmul.msk.bf16.vlgmr.msrb.gmra.mxu2 %vm83_vm2, %v1335_v44  ;;  %1650 = vmatmul.msk.bf16.vlgmr.msrb.gmra.mxu1 %vm83_vm2, %v1335_v44 }
 0xb88   :  { %v1322_v46 = vpop.xlane.xlu0 %1321 }
 0xb89   :  { %v1326_v11 = vsub.f32 %v1310_v1, %v1322_v46 }
 0xb8b   :  { %v1333_v47 = vmul.f32 1.442695, %v1326_v11  ;;  %v1793_v50 = vpop.eup %1792 }
 0xb8d   :  { %1794 = vpow2.f32 %v1333_v47 }
 0xb93   :  { %v1795_v52 = vpop.eup %1794 }
 0xb94   :  { %v1336_v53 = vpack.c.bf16 %v1795_v52, %v1793_v50 }
 0xb96   :  { %1649 = vmatmul.msk.bf16.gmra.mxu2 %vm83_vm2, %v1336_v53  ;;  %1651 = vmatmul.msk.bf16.gmra.mxu1 %vm83_vm2, %v1336_v53 }
 0xb9b   :  { %v1477_v34 = vpop.permute.xlu0 %1476 }
 0xc09   :  { %v1364_v17 = vpop.f32.mrf.mxu2 }
 0xc0a   :  { %1796 = vrcp.f32 %v1364_v17  ;;  %v1385_v19 = vand.u32 2147483648, %v1364_v17  ;;  %v1383_v55 = vand.u32 2147483647, %v1364_v17  ;;  %vm1379_vm12 = vweird.f32 %v1364_v17 }
 0xc0c   :  { %v1386_v62 = vor.u32 1.1754944e-38, %v1385_v19  ;;  %vm1384_vm2 = vcmp.eq.f32.partialorder %v1383_v55, 8.507059e+37 }
 0xc10   :  { %v1797_v41 = vpop.eup %1796 }
 0xc11   :  { %v1375_v56 = vmul.f32 %v1797_v41, %v1364_v17  ;;  %v1366_v58 = vpop.f32.mrf.mxu2  ;;  %vm1380_vm11 = vweird.f32 %v1797_v41 }
 0xc12   :  { %1798 = vrcp.f32 %v1366_v58  ;;  %vm1381_vm13 = vmor %vm1379_vm12, %vm1380_vm11  ;;  %v1399_v39 = vand.u32 2147483648, %v1366_v58  ;;  %v1397_v3 = vand.u32 2147483647, %v1366_v58  ;;  %vm1393_vm15 = vweird.f32 %v1366_v58 }
 0xc13   :  { %v1376_v21 = vsub.f32 1.0, %v1375_v56 }
 0xc14   :  { %v1400_v9 = vor.u32 1.1754944e-38, %v1399_v39  ;;  %vm1398_vm1 = vcmp.eq.f32.partialorder %v1397_v3, 8.507059e+37 }
 0xc15   :  { %v1377_v54 = vmul.f32 %v1797_v41, %v1376_v21 }
 0xc17   :  { %v1378_v60 = vadd.f32 %v1797_v41, %v1377_v54 }
 0xc18   :  { %v1799_v30 = vpop.eup %1798 }
 0xc19   :  { %v1389_v20 = vmul.f32 %v1799_v30, %v1366_v58  ;;  %v1369_v27 = vpop.f32.mrf.mxu2  ;;  %v1382_v31 = vsel %vm1381_vm13, %v1797_v41, %v1378_v60  ;;  %vm1394_vm14 = vweird.f32 %v1799_v30 }
 0xc1a   :  { %1800 = vrcp.f32 %v1369_v27  ;;  %v1387_v33 = vsel %vm1384_vm2, %v1386_v62, %v1382_v31  ;;  %vm1395_vm0 = vmor %vm1393_vm15, %vm1394_vm14  ;;  %v1413_v6 = vand.u32 2147483648, %v1369_v27  ;;  %v1411_v12 = vand.u32 2147483647, %v1369_v27 }
 0xc1b   :  { %v1390_v36 = vsub.f32 1.0, %v1389_v20  ;;  %1454 = vperm.xlu2 %1753, %v1387_v33   ;;  %vm1407_vm5 = vweird.f32 %v1369_v27 }
 0xc1c   :  { %v1414_v15 = vor.u32 1.1754944e-38, %v1413_v6  ;;  %vm1412_vm7 = vcmp.eq.f32.partialorder %v1411_v12, 8.507059e+37 }
 0xc1d   :  { %v1391_v45 = vmul.f32 %v1799_v30, %v1390_v36 }
 0xc1f   :  { %v1392_v37 = vadd.f32 %v1799_v30, %v1391_v45 }
 0xc20   :  { %v1801_v59 = vpop.eup %1800 }
 0xc21   :  { %v1403_v25 = vmul.f32 %v1801_v59, %v1369_v27  ;;  %v1371_v42 = vpop.f32.mrf.mxu2  ;;  %v1396_v48 = vsel %vm1395_vm0, %v1799_v30, %v1392_v37  ;;  %vm1408_vm4 = vweird.f32 %v1801_v59 }
 0xc22   :  { %1802 = vrcp.f32 %v1371_v42  ;;  %v1401_v61 = vsel %vm1398_vm1, %v1400_v9, %v1396_v48  ;;  %vm1409_vm3 = vmor %vm1407_vm5, %vm1408_vm4  ;;  %v1427_v18 = vand.u32 2147483648, %v1371_v42  ;;  %v1425_v1 = vand.u32 2147483647, %v1371_v42 }
 0xc23   :  { %v1404_v57 = vsub.f32 1.0, %v1403_v25  ;;  %1459 = vperm.xlu1 %1754, %v1401_v61   ;;  %vm1421_vm9 = vweird.f32 %v1371_v42 }
 0xc24   :  { %v1428_v26 = vor.u32 1.1754944e-38, %v1427_v18  ;;  %vm1426_vm11 = vcmp.eq.f32.partialorder %v1425_v1, 8.507059e+37 }
 0xc25   :  { %v1405_v63 = vmul.f32 %v1801_v59, %v1404_v57 }
 0xc27   :  { %v1406_v0 = vadd.f32 %v1801_v59, %v1405_v63 }
 0xc28   :  { %v1803_v43 = vpop.eup %1802 }
 0xc29   :  { %v1417_v14 = vmul.f32 %v1803_v43, %v1371_v42  ;;  %v1410_v8 = vsel %vm1409_vm3, %v1801_v59, %v1406_v0  ;;  %vm1422_vm8 = vweird.f32 %v1803_v43 }
 0xc2a   :  { %v1415_v7 = vsel %vm1412_vm7, %v1414_v15, %v1410_v8  ;;  %vm1423_vm10 = vmor %vm1421_vm9, %vm1422_vm8 }
 0xc2b   :  { %v1418_v16 = vsub.f32 1.0, %v1417_v14  ;;  %1478 = vrot.lane.b32.xlu1 %v2316_v4, %s1839_s10  ;;  %1464 = vperm.xlu0 %1748, %v1415_v7   ;;  %v1441_v4 = vpop.f32.mrf.mxu1 }
 0xc2d   :  { %v1419_v49 = vmul.f32 %v1803_v43, %v1418_v16 }
 0xc2f   :  { %v1420_v22 = vadd.f32 %v1803_v43, %v1419_v49 }
 0xc31   :  { %v1424_v51 = vsel %vm1423_vm10, %v1803_v43, %v1420_v22 }
 0xc32   :  { %v1429_v23 = vsel %vm1426_vm11, %v1428_v26, %v1424_v51 }
 0xc33   :  { %1482 = vrot.lane.b32.xlu0 %v2324_v10, %s1839_s10  ;;  %1469 = vperm.xlu2 %1753, %v1429_v23   ;;  %v1443_v10 = vpop.f32.mrf.mxu1 }
 0xc3b   :  { %1480 = vrot.lane.b32.xlu2 %v2320_v2, %s1839_s10  ;;  %v1446_v44 = vpop.f32.mrf.mxu1 }
 0xc43   :  { %v1448_v17 = vpop.f32.mrf.mxu1 }
 0xc75   :  { %v1455_v28 = vpop.permute.xlu2 %1454 }
 0xc76   :  { %v1472_v29 = vmul.f32 %v1455_v28, %v1441_v4 }
 0xc78   :  { %v1488_v38 = vadd.f32 %v1477_v34, %v1472_v29 }
 0xc7a   :  { %v1493_v5 = vadd.f32 %v1755_v32, %v1488_v38 }
 0xc7c   :  { %1497 = vst.msk [vmem:[%s2383_s4] sm:$0xff] %vm1180_vm6, %v1493_v5 }
 0xc8d   :  { %v1470_v35 = vpop.permute.xlu2 %1469 }
 0xc8e   :  { %v1475_v41 = vmul.f32 %v1470_v35, %v1448_v17 }
 0xc95   :  { %v1460_v40 = vpop.permute.xlu1 %1459  ;;  %v1481_v47 = vpop.permute.xlu2 %1480 }
 0xc96   :  { %v1473_v2 = vmul.f32 %v1460_v40, %v1443_v10 }
 0xc9d   :  { %v1465_v24 = vpop.permute.xlu0 %1464  ;;  %v1479_v13 = vpop.permute.xlu1 %1478 }
 0xc9e   :  { %v1474_v46 = vmul.f32 %v1465_v24, %v1446_v44  ;;  %v1489_v11 = vadd.f32 %v1479_v13, %v1473_v2 }
 0xca0   :  { %v1490_v50 = vadd.f32 %v1481_v47, %v1474_v46  ;;  %v1494_v52 = vadd.f32 %v1755_v32, %v1489_v11 }
 0xca2   :  { %v1495_v53 = vadd.f32 %v1755_v32, %v1490_v50  ;;  %1498 = vst.msk [vmem:[%s2383_s4 + $0x8] sm:$0xff] %vm1180_vm6, %v1494_v52 }
 0xca4   :  { %1499 = vst.msk [vmem:[%s2383_s4 + $0x10] sm:$0xff] %vm1180_vm6, %v1495_v53 }
 0xca5   :  { %v1483_v56 = vpop.permute.xlu0 %1482 }
 0xca6   :  { %v1491_v58 = vadd.f32 %v1483_v56, %v1475_v41 }
 0xca8   :  { %v1496_v21 = vadd.f32 %v1755_v32, %v1491_v58 }
 0xcaa   :  { %1500 = vst.msk [vmem:[%s2383_s4 + $0x18] sm:$0xff] %vm1180_vm6, %v1496_v21 }
 0xcab   :  { %1505 = vsyncpa [#allocation3], 1 }

</bundles_post_ra>
